<compile_context>
chip_gen: v6e
topology: v6e:2x2x1
jax: 0.10.0
libtpu: 0.0.40
codegen_flags: <defaults>
</compile_context>

<pallas_src>
import functools

import jax
import jax.numpy as jnp
from jax import lax
from jax.experimental import pallas as pl
from jax.experimental.pallas import tpu as pltpu

EPS = 1e-5
LANE = 128
VMEM_LIMIT = 32 * 1024 * 1024


def _round_up(x, m):
    return (x + m - 1) // m * m


def _row_tile(h, w, max_elems):
    """Largest divisor of h such that tile_rows * w <= max_elems (>= 1)."""
    t = max(1, min(h, max_elems // max(w, 1)))
    while h % t:
        t -= 1
    return t


# ----------------------------- Pallas kernels -----------------------------

def _conv_stats_kernel(xp_ref, w_ref, b_ref, y_ref, sum_ref, sqsum_ref, *, th, w_out):
    """3x3 conv (padding already applied) + fused per-channel sum / sqsum.

    xp_ref : (1, H+2, W+2, Cin)  padded input image (resident across inner axes)
    w_ref  : (9, Cin, 128)       weight slab for this cout tile (tap-major)
    b_ref  : (1, 128)            conv bias
    y_ref  : (1, th, W, 128)     conv output rows for this (n, hb, jc)
    sum_ref, sqsum_ref : (1, 128) BN partial sums, accumulated over the grid.
    """
    n_idx = pl.program_id(1)
    hb = pl.program_id(2)

    @pl.when((n_idx == 0) & (hb == 0))
    def _():
        sum_ref[...] = jnp.zeros_like(sum_ref)
        sqsum_ref[...] = jnp.zeros_like(sqsum_ref)

    tn = w_ref.shape[2]

    def row_body(r, carry):
        h = hb * th + r                      # output row == top row of the 3-row window
        acc = jnp.zeros((w_out, tn), jnp.float32)
        for ky in range(3):
            for kx in range(3):
                patch = xp_ref[0, pl.ds(h + ky, 1), pl.ds(kx, w_out), :][0]   # (W, Cin)
                acc += jnp.dot(patch, w_ref[ky * 3 + kx],
                               preferred_element_type=jnp.float32)
        acc = acc + b_ref[...]               # (1,128) broadcast over rows
        y_ref[0, pl.ds(r, 1)] = acc[None, :, :]
        sum_ref[...] += jnp.sum(acc, axis=0, keepdims=True)
        sqsum_ref[...] += jnp.sum(acc * acc, axis=0, keepdims=True)
        return carry

    lax.fori_loop(0, th, row_body, 0)


def _bn_relu_kernel(y_ref, scale_ref, shift_ref, o_ref):
    # y_ref/o_ref: (1, thb, W, 128); scale/shift: (1, 128)
    y = y_ref[...]
    o_ref[...] = jnp.maximum(y * scale_ref[...] + shift_ref[...], 0.0)


# ----------------------------- wrappers ------------------------------------

def _conv_bn_stats(xp, w9, bias, th):
    """Run the tiled conv + stats kernel. Returns (y, sum, sqsum)."""
    n, hp2, wp2, cin = xp.shape
    h, w = hp2 - 2, wp2 - 2
    cpad = w9.shape[2]
    n_jc = cpad // LANE
    n_hb = h // th

    kernel = functools.partial(_conv_stats_kernel, th=th, w_out=w)
    return pl.pallas_call(
        kernel,
        out_shape=(
            jax.ShapeDtypeStruct((n, h, w, cpad), jnp.float32),
            jax.ShapeDtypeStruct((1, cpad), jnp.float32),
            jax.ShapeDtypeStruct((1, cpad), jnp.float32),
        ),
        grid=(n_jc, n, n_hb),
        in_specs=[
            pl.BlockSpec((1, hp2, wp2, cin), lambda jc, ni, hb: (ni, 0, 0, 0)),
            pl.BlockSpec((9, cin, LANE), lambda jc, ni, hb: (0, 0, jc)),
            pl.BlockSpec((1, LANE), lambda jc, ni, hb: (0, jc)),
        ],
        out_specs=(
            pl.BlockSpec((1, th, w, LANE), lambda jc, ni, hb: (ni, hb, 0, jc)),
            pl.BlockSpec((1, LANE), lambda jc, ni, hb: (0, jc)),
            pl.BlockSpec((1, LANE), lambda jc, ni, hb: (0, jc)),
        ),
        compiler_params=pltpu.CompilerParams(
            dimension_semantics=("parallel", "arbitrary", "arbitrary"),
            vmem_limit_bytes=VMEM_LIMIT,
        ),
    )(xp, w9, bias)


def _bn_relu(y, s, sq, gamma_pad, beta_pad, thb):
    """Fused (x - mean)/std * gamma + beta -> ReLU, tiled over rows."""
    n, h, w, cpad = y.shape
    m = n * h * w
    mean = s / m
    var = jnp.maximum(sq / m - mean * mean, 0.0)   # biased var, clamped >= 0
    scale = gamma_pad * lax.rsqrt(var + EPS)       # (1, Cpad)
    shift = beta_pad - mean * scale                # (1, Cpad)

    n_jc = cpad // LANE
    n_hb = h // thb
    return pl.pallas_call(
        _bn_relu_kernel,
        out_shape=jax.ShapeDtypeStruct((n, h, w, cpad), jnp.float32),
        grid=(n, n_hb, n_jc),
        in_specs=[
            pl.BlockSpec((1, thb, w, LANE), lambda ni, hb, jc: (ni, hb, 0, jc)),
            pl.BlockSpec((1, LANE), lambda ni, hb, jc: (0, jc)),
            pl.BlockSpec((1, LANE), lambda ni, hb, jc: (0, jc)),
        ],
        out_specs=pl.BlockSpec((1, thb, w, LANE), lambda ni, hb, jc: (ni, hb, 0, jc)),
        compiler_params=pltpu.CompilerParams(
            dimension_semantics=("parallel", "parallel", "parallel"),
            vmem_limit_bytes=VMEM_LIMIT,
        ),
    )(y, scale, shift)


def _conv_bn_relu(x_nhwc, w, b, gamma, beta):
    """One Conv3x3(pad=1) + BatchNorm(batch stats) + ReLU block.

    x_nhwc: (N, H, W, Cin); w: PyTorch layout (Cout, Cin, 3, 3).
    Returns (out_padded (N,H,W,Cout_pad), Cout). Padded channels are exactly 0.
    """
    n, h, wdt, cin = x_nhwc.shape
    cout = w.shape[0]
    cpad = _round_up(cout, LANE)

    # Weights -> (ky,kx,Cin,Cout) -> (9, Cin, Cout) -> zero-pad Cout to lane-dense.
    w9 = jnp.transpose(w, (2, 3, 1, 0)).reshape(9, cin, cout)
    w9 = jnp.pad(w9, ((0, 0), (0, 0), (0, cpad - cout)))
    b_p = jnp.pad(b, (0, cpad - cout)).reshape(1, cpad)
    g_p = jnp.pad(gamma, (0, cpad - cout)).reshape(1, cpad)
    be_p = jnp.pad(beta, (0, cpad - cout)).reshape(1, cpad)

    xp = jnp.pad(x_nhwc, ((0, 0), (1, 1), (1, 1), (0, 0)))   # spatial halo pad

    th = _row_tile(h, wdt, 4096)     # conv output rows per grid step
    y, s, sq = _conv_bn_stats(xp, w9, b_p, th)

    thb = _row_tile(h, wdt, 8192)    # BN/ReLU rows per grid step
    out = _bn_relu(y, s, sq, g_p, be_p, thb)
    return out, cout


def double_conv(x_nchw, params):
    """DoubleConv forward. x_nchw: (N, Cin, H, W) float32 -> (N, Cout, H, W)."""
    x = jnp.transpose(x_nchw, (0, 2, 3, 1))                  # NCHW -> NHWC
    h1, _ = _conv_bn_relu(x, params["w1"], params["b1"], params["g1"], params["be1"])
    # h1 is channel-padded to a multiple of 128 with exact zeros; conv2 consumes
    # it directly with its weights zero-padded on the input-channel axis.
    cin2_pad = h1.shape[-1]
    w2 = params["w2"]
    w2p = jnp.pad(w2, ((0, 0), (0, cin2_pad - w2.shape[1]), (0, 0), (0, 0)))
    h2, cout2 = _conv_bn_relu(h1, w2p, params["b2"], params["g2"], params["be2"])
    return jnp.transpose(h2[..., :cout2], (0, 3, 1, 2))      # NHWC -> NCHW


def init_params(key, in_channels, out_channels):
    k1, k2, k3, k4 = jax.random.split(key, 4)
    return {
        "w1": 0.1 * jax.random.normal(k1, (out_channels, in_channels, 3, 3), jnp.float32),
        "b1": 0.01 * jax.random.normal(k2, (out_channels,), jnp.float32),
        "g1": jnp.ones((out_channels,), jnp.float32),
        "be1": jnp.zeros((out_channels,), jnp.float32),
        "w2": 0.1 * jax.random.normal(k3, (out_channels, out_channels, 3, 3), jnp.float32),
        "b2": 0.01 * jax.random.normal(k4, (out_channels,), jnp.float32),
        "g2": jnp.ones((out_channels,), jnp.float32),
        "be2": jnp.zeros((out_channels,), jnp.float32),
    }


# ----------------------------- reference (pure JAX) -------------------------

def _reference(x_nchw, params):
    def block(x, w, b, g, be):
        y = lax.conv_general_dilated(
            x, w, window_strides=(1, 1), padding="SAME",
            dimension_numbers=("NCHW", "OIHW", "NCHW"))
        y = y + b[None, :, None, None]
        mean = jnp.mean(y, axis=(0, 2, 3), keepdims=True)
        var = jnp.var(y, axis=(0, 2, 3), keepdims=True)
        y = (y - mean) * lax.rsqrt(var + EPS)
        y = y * g[None, :, None, None] + be[None, :, None, None]
        return jnp.maximum(y, 0.0)

    x = block(x_nchw, params["w1"], params["b1"], params["g1"], params["be1"])
    x = block(x, params["w2"], params["b2"], params["g2"], params["be2"])
    return x


if __name__ == "__main__":
    key = jax.random.PRNGKey(0)
    k_in, k_par = jax.random.split(key)
    N, CIN, COUT, H, W = 2, 4, 8, 16, 16
    x = jax.random.normal(k_in, (N, CIN, H, W), jnp.float32)
    params = init_params(k_par, CIN, COUT)

    out = jax.jit(double_conv)(x, params)
    jax.block_until_ready(out)
    assert out.shape == (N, COUT, H, W)

    ref = _reference(x, params)
    jax.block_until_ready(ref)
    max_err = float(jnp.max(jnp.abs(out - ref)))
    assert max_err < 1e-1, f"mismatch vs reference: {max_err}"

    print("KERNEL_OK")
</pallas_src>

<mosaic_0001>
module attributes {stable_mosaic.version = 11 : i64} {
  func.func @_conv_stats_kernel(%arg0: i32, %arg1: i32, %arg2: i32, %arg3: memref<1x18x18x4xf32, #tpu.memory_space<vmem>>, %arg4: memref<9x4x128xf32, #tpu.memory_space<vmem>>, %arg5: memref<1x128xf32, #tpu.memory_space<vmem>>, %arg6: memref<1x16x16x128xf32, #tpu.memory_space<vmem>>, %arg7: memref<1x128xf32, #tpu.memory_space<vmem>>, %arg8: memref<1x128xf32, #tpu.memory_space<vmem>>) attributes {dimension_semantics = [#tpu.dimension_semantics<parallel>, #tpu.dimension_semantics<arbitrary>, #tpu.dimension_semantics<arbitrary>], iteration_bounds = array<i64: 1, 2, 1>, scalar_prefetch = 0 : i64, scratch_operands = 0 : i64, tpu.core_type = #tpu.core_type<tc>, window_params = [{transform_indices = @transform_0, window_bounds = array<i64: 1, 18, 18, 4>}, {transform_indices = @transform_1, window_bounds = array<i64: 9, 4, 128>}, {transform_indices = @transform_2, window_bounds = array<i64: 1, 128>}, {transform_indices = @transform_3, window_bounds = array<i64: 1, 16, 16, 128>}, {transform_indices = @transform_4, window_bounds = array<i64: 1, 128>}, {transform_indices = @transform_5, window_bounds = array<i64: 1, 128>}]} {
    %c0_i32 = arith.constant 0 : i32
    %0 = arith.cmpi eq, %arg1, %c0_i32 : i32
    %c0_i32_0 = arith.constant 0 : i32
    %1 = arith.cmpi eq, %arg2, %c0_i32_0 : i32
    %2 = arith.andi %0, %1 : i1
    %3 = arith.extui %2 : i1 to i32
    %c0_i32_1 = arith.constant 0 : i32
    %4 = arith.cmpi ne, %3, %c0_i32_1 : i32
    scf.if %4 {
      %cst = arith.constant 0.000000e+00 : f32
      %6 = vector.broadcast %cst : f32 to vector<1x128xf32>
      %c0 = arith.constant 0 : index
      %c0_4 = arith.constant 0 : index
      %7 = vector.load %arg7[%c0, %c0_4] : memref<1x128xf32, #tpu.memory_space<vmem>>, vector<1x128xf32>
      tpu.vector_store %arg7[%c0, %c0_4], %6 {strides = array<i32>} : memref<1x128xf32, #tpu.memory_space<vmem>>, vector<1x128xf32>,
      %cst_5 = arith.constant 0.000000e+00 : f32
      %8 = vector.broadcast %cst_5 : f32 to vector<1x128xf32>
      %c0_6 = arith.constant 0 : index
      %c0_7 = arith.constant 0 : index
      %9 = vector.load %arg8[%c0_6, %c0_7] : memref<1x128xf32, #tpu.memory_space<vmem>>, vector<1x128xf32>
      tpu.vector_store %arg8[%c0_6, %c0_7], %8 {strides = array<i32>} : memref<1x128xf32, #tpu.memory_space<vmem>>, vector<1x128xf32>,
    } else {
    }
    %c0_i32_2 = arith.constant 0 : i32
    %c16_i32 = arith.constant 16 : i32
    %5 = arith.addi %c0_i32_2, %c16_i32 : i32
    %c1_i32 = arith.constant 1 : i32
    scf.for %arg9 = %c0_i32_2 to %5 step %c1_i32  : i32 {
      %c16_i32_4 = arith.constant 16 : i32
      %6 = arith.muli %arg2, %c16_i32_4 : i32
      %7 = arith.addi %6, %arg9 : i32
      %cst = arith.constant 0.000000e+00 : f32
      %8 = vector.broadcast %cst : f32 to vector<16x128xf32>
      %c0_i32_5 = arith.constant 0 : i32
      %9 = arith.addi %7, %c0_i32_5 : i32
      %c0 = arith.constant 0 : index
      %10 = arith.index_cast %9 : i32 to index
      %c0_6 = arith.constant 0 : index
      %c0_7 = arith.constant 0 : index
      %11 = vector.load %arg3[%c0, %10, %c0_6, %c0_7] : memref<1x18x18x4xf32, #tpu.memory_space<vmem>>, vector<1x1x16x4xf32>
      %12 = vector.shape_cast %11 : vector<1x1x16x4xf32> to vector<1x16x4xf32>
      %13 = vector.shape_cast %12 : vector<1x16x4xf32> to vector<16x4xf32>
      %c0_8 = arith.constant 0 : index
      %c0_9 = arith.constant 0 : index
      %c0_10 = arith.constant 0 : index
      %14 = vector.load %arg4[%c0_8, %c0_9, %c0_10] : memref<9x4x128xf32, #tpu.memory_space<vmem>>, vector<1x4x128xf32>
      %15 = vector.shape_cast %14 : vector<1x4x128xf32> to vector<4x128xf32>
      %cst_11 = arith.constant dense<0.000000e+00> : vector<16x128xf32>
      %16 = tpu.matmul %13, %15, %cst_11 {dimension_numbers = #tpu.dot_dimension_numbers<[1], [0], [0], [1], [0, 0, 1, 1], [], []>} : vector<16x4xf32>, vector<4x128xf32>, vector<16x128xf32> -> vector<16x128xf32>
      %17 = arith.addf %8, %16 : vector<16x128xf32>
      %c0_i32_12 = arith.constant 0 : i32
      %18 = arith.addi %7, %c0_i32_12 : i32
      %c0_13 = arith.constant 0 : index
      %19 = arith.index_cast %18 : i32 to index
      %c1 = arith.constant 1 : index
      %c0_14 = arith.constant 0 : index
      %20 = vector.load %arg3[%c0_13, %19, %c1, %c0_14] : memref<1x18x18x4xf32, #tpu.memory_space<vmem>>, vector<1x1x16x4xf32>
      %21 = vector.shape_cast %20 : vector<1x1x16x4xf32> to vector<1x16x4xf32>
      %22 = vector.shape_cast %21 : vector<1x16x4xf32> to vector<16x4xf32>
      %c1_15 = arith.constant 1 : index
      %c0_16 = arith.constant 0 : index
      %c0_17 = arith.constant 0 : index
      %23 = vector.load %arg4[%c1_15, %c0_16, %c0_17] : memref<9x4x128xf32, #tpu.memory_space<vmem>>, vector<1x4x128xf32>
      %24 = vector.shape_cast %23 : vector<1x4x128xf32> to vector<4x128xf32>
      %cst_18 = arith.constant dense<0.000000e+00> : vector<16x128xf32>
      %25 = tpu.matmul %22, %24, %cst_18 {dimension_numbers = #tpu.dot_dimension_numbers<[1], [0], [0], [1], [0, 0, 1, 1], [], []>} : vector<16x4xf32>, vector<4x128xf32>, vector<16x128xf32> -> vector<16x128xf32>
      %26 = arith.addf %17, %25 : vector<16x128xf32>
      %c0_i32_19 = arith.constant 0 : i32
      %27 = arith.addi %7, %c0_i32_19 : i32
      %c0_20 = arith.constant 0 : index
      %28 = arith.index_cast %27 : i32 to index
      %c2 = arith.constant 2 : index
      %c0_21 = arith.constant 0 : index
      %29 = vector.load %arg3[%c0_20, %28, %c2, %c0_21] : memref<1x18x18x4xf32, #tpu.memory_space<vmem>>, vector<1x1x16x4xf32>
      %30 = vector.shape_cast %29 : vector<1x1x16x4xf32> to vector<1x16x4xf32>
      %31 = vector.shape_cast %30 : vector<1x16x4xf32> to vector<16x4xf32>
      %c2_22 = arith.constant 2 : index
      %c0_23 = arith.constant 0 : index
      %c0_24 = arith.constant 0 : index
      %32 = vector.load %arg4[%c2_22, %c0_23, %c0_24] : memref<9x4x128xf32, #tpu.memory_space<vmem>>, vector<1x4x128xf32>
      %33 = vector.shape_cast %32 : vector<1x4x128xf32> to vector<4x128xf32>
      %cst_25 = arith.constant dense<0.000000e+00> : vector<16x128xf32>
      %34 = tpu.matmul %31, %33, %cst_25 {dimension_numbers = #tpu.dot_dimension_numbers<[1], [0], [0], [1], [0, 0, 1, 1], [], []>} : vector<16x4xf32>, vector<4x128xf32>, vector<16x128xf32> -> vector<16x128xf32>
      %35 = arith.addf %26, %34 : vector<16x128xf32>
      %c1_i32_26 = arith.constant 1 : i32
      %36 = arith.addi %7, %c1_i32_26 : i32
      %c0_27 = arith.constant 0 : index
      %37 = arith.index_cast %36 : i32 to index
      %c0_28 = arith.constant 0 : index
      %c0_29 = arith.constant 0 : index
      %38 = vector.load %arg3[%c0_27, %37, %c0_28, %c0_29] : memref<1x18x18x4xf32, #tpu.memory_space<vmem>>, vector<1x1x16x4xf32>
      %39 = vector.shape_cast %38 : vector<1x1x16x4xf32> to vector<1x16x4xf32>
      %40 = vector.shape_cast %39 : vector<1x16x4xf32> to vector<16x4xf32>
      %c3 = arith.constant 3 : index
      %c0_30 = arith.constant 0 : index
      %c0_31 = arith.constant 0 : index
      %41 = vector.load %arg4[%c3, %c0_30, %c0_31] : memref<9x4x128xf32, #tpu.memory_space<vmem>>, vector<1x4x128xf32>
      %42 = vector.shape_cast %41 : vector<1x4x128xf32> to vector<4x128xf32>
      %cst_32 = arith.constant dense<0.000000e+00> : vector<16x128xf32>
      %43 = tpu.matmul %40, %42, %cst_32 {dimension_numbers = #tpu.dot_dimension_numbers<[1], [0], [0], [1], [0, 0, 1, 1], [], []>} : vector<16x4xf32>, vector<4x128xf32>, vector<16x128xf32> -> vector<16x128xf32>
      %44 = arith.addf %35, %43 : vector<16x128xf32>
      %c1_i32_33 = arith.constant 1 : i32
      %45 = arith.addi %7, %c1_i32_33 : i32
      %c0_34 = arith.constant 0 : index
      %46 = arith.index_cast %45 : i32 to index
      %c1_35 = arith.constant 1 : index
      %c0_36 = arith.constant 0 : index
      %47 = vector.load %arg3[%c0_34, %46, %c1_35, %c0_36] : memref<1x18x18x4xf32, #tpu.memory_space<vmem>>, vector<1x1x16x4xf32>
      %48 = vector.shape_cast %47 : vector<1x1x16x4xf32> to vector<1x16x4xf32>
      %49 = vector.shape_cast %48 : vector<1x16x4xf32> to vector<16x4xf32>
      %c4 = arith.constant 4 : index
      %c0_37 = arith.constant 0 : index
      %c0_38 = arith.constant 0 : index
      %50 = vector.load %arg4[%c4, %c0_37, %c0_38] : memref<9x4x128xf32, #tpu.memory_space<vmem>>, vector<1x4x128xf32>
      %51 = vector.shape_cast %50 : vector<1x4x128xf32> to vector<4x128xf32>
      %cst_39 = arith.constant dense<0.000000e+00> : vector<16x128xf32>
      %52 = tpu.matmul %49, %51, %cst_39 {dimension_numbers = #tpu.dot_dimension_numbers<[1], [0], [0], [1], [0, 0, 1, 1], [], []>} : vector<16x4xf32>, vector<4x128xf32>, vector<16x128xf32> -> vector<16x128xf32>
      %53 = arith.addf %44, %52 : vector<16x128xf32>
      %c1_i32_40 = arith.constant 1 : i32
      %54 = arith.addi %7, %c1_i32_40 : i32
      %c0_41 = arith.constant 0 : index
      %55 = arith.index_cast %54 : i32 to index
      %c2_42 = arith.constant 2 : index
      %c0_43 = arith.constant 0 : index
      %56 = vector.load %arg3[%c0_41, %55, %c2_42, %c0_43] : memref<1x18x18x4xf32, #tpu.memory_space<vmem>>, vector<1x1x16x4xf32>
      %57 = vector.shape_cast %56 : vector<1x1x16x4xf32> to vector<1x16x4xf32>
      %58 = vector.shape_cast %57 : vector<1x16x4xf32> to vector<16x4xf32>
      %c5 = arith.constant 5 : index
      %c0_44 = arith.constant 0 : index
      %c0_45 = arith.constant 0 : index
      %59 = vector.load %arg4[%c5, %c0_44, %c0_45] : memref<9x4x128xf32, #tpu.memory_space<vmem>>, vector<1x4x128xf32>
      %60 = vector.shape_cast %59 : vector<1x4x128xf32> to vector<4x128xf32>
      %cst_46 = arith.constant dense<0.000000e+00> : vector<16x128xf32>
      %61 = tpu.matmul %58, %60, %cst_46 {dimension_numbers = #tpu.dot_dimension_numbers<[1], [0], [0], [1], [0, 0, 1, 1], [], []>} : vector<16x4xf32>, vector<4x128xf32>, vector<16x128xf32> -> vector<16x128xf32>
      %62 = arith.addf %53, %61 : vector<16x128xf32>
      %c2_i32 = arith.constant 2 : i32
      %63 = arith.addi %7, %c2_i32 : i32
      %c0_47 = arith.constant 0 : index
      %64 = arith.index_cast %63 : i32 to index
      %c0_48 = arith.constant 0 : index
      %c0_49 = arith.constant 0 : index
      %65 = vector.load %arg3[%c0_47, %64, %c0_48, %c0_49] : memref<1x18x18x4xf32, #tpu.memory_space<vmem>>, vector<1x1x16x4xf32>
      %66 = vector.shape_cast %65 : vector<1x1x16x4xf32> to vector<1x16x4xf32>
      %67 = vector.shape_cast %66 : vector<1x16x4xf32> to vector<16x4xf32>
      %c6 = arith.constant 6 : index
      %c0_50 = arith.constant 0 : index
      %c0_51 = arith.constant 0 : index
      %68 = vector.load %arg4[%c6, %c0_50, %c0_51] : memref<9x4x128xf32, #tpu.memory_space<vmem>>, vector<1x4x128xf32>
      %69 = vector.shape_cast %68 : vector<1x4x128xf32> to vector<4x128xf32>
      %cst_52 = arith.constant dense<0.000000e+00> : vector<16x128xf32>
      %70 = tpu.matmul %67, %69, %cst_52 {dimension_numbers = #tpu.dot_dimension_numbers<[1], [0], [0], [1], [0, 0, 1, 1], [], []>} : vector<16x4xf32>, vector<4x128xf32>, vector<16x128xf32> -> vector<16x128xf32>
      %71 = arith.addf %62, %70 : vector<16x128xf32>
      %c2_i32_53 = arith.constant 2 : i32
      %72 = arith.addi %7, %c2_i32_53 : i32
      %c0_54 = arith.constant 0 : index
      %73 = arith.index_cast %72 : i32 to index
      %c1_55 = arith.constant 1 : index
      %c0_56 = arith.constant 0 : index
      %74 = vector.load %arg3[%c0_54, %73, %c1_55, %c0_56] : memref<1x18x18x4xf32, #tpu.memory_space<vmem>>, vector<1x1x16x4xf32>
      %75 = vector.shape_cast %74 : vector<1x1x16x4xf32> to vector<1x16x4xf32>
      %76 = vector.shape_cast %75 : vector<1x16x4xf32> to vector<16x4xf32>
      %c7 = arith.constant 7 : index
      %c0_57 = arith.constant 0 : index
      %c0_58 = arith.constant 0 : index
      %77 = vector.load %arg4[%c7, %c0_57, %c0_58] : memref<9x4x128xf32, #tpu.memory_space<vmem>>, vector<1x4x128xf32>
      %78 = vector.shape_cast %77 : vector<1x4x128xf32> to vector<4x128xf32>
      %cst_59 = arith.constant dense<0.000000e+00> : vector<16x128xf32>
      %79 = tpu.matmul %76, %78, %cst_59 {dimension_numbers = #tpu.dot_dimension_numbers<[1], [0], [0], [1], [0, 0, 1, 1], [], []>} : vector<16x4xf32>, vector<4x128xf32>, vector<16x128xf32> -> vector<16x128xf32>
      %80 = arith.addf %71, %79 : vector<16x128xf32>
      %c2_i32_60 = arith.constant 2 : i32
      %81 = arith.addi %7, %c2_i32_60 : i32
      %c0_61 = arith.constant 0 : index
      %82 = arith.index_cast %81 : i32 to index
      %c2_62 = arith.constant 2 : index
      %c0_63 = arith.constant 0 : index
      %83 = vector.load %arg3[%c0_61, %82, %c2_62, %c0_63] : memref<1x18x18x4xf32, #tpu.memory_space<vmem>>, vector<1x1x16x4xf32>
      %84 = vector.shape_cast %83 : vector<1x1x16x4xf32> to vector<1x16x4xf32>
      %85 = vector.shape_cast %84 : vector<1x16x4xf32> to vector<16x4xf32>
      %c8 = arith.constant 8 : index
      %c0_64 = arith.constant 0 : index
      %c0_65 = arith.constant 0 : index
      %86 = vector.load %arg4[%c8, %c0_64, %c0_65] : memref<9x4x128xf32, #tpu.memory_space<vmem>>, vector<1x4x128xf32>
      %87 = vector.shape_cast %86 : vector<1x4x128xf32> to vector<4x128xf32>
      %cst_66 = arith.constant dense<0.000000e+00> : vector<16x128xf32>
      %88 = tpu.matmul %85, %87, %cst_66 {dimension_numbers = #tpu.dot_dimension_numbers<[1], [0], [0], [1], [0, 0, 1, 1], [], []>} : vector<16x4xf32>, vector<4x128xf32>, vector<16x128xf32> -> vector<16x128xf32>
      %89 = arith.addf %80, %88 : vector<16x128xf32>
      %c0_67 = arith.constant 0 : index
      %c0_68 = arith.constant 0 : index
      %90 = vector.load %arg5[%c0_67, %c0_68] : memref<1x128xf32, #tpu.memory_space<vmem>>, vector<1x128xf32>
      %91 = vector.broadcast %90 : vector<1x128xf32> to vector<16x128xf32>
      %92 = arith.addf %89, %91 : vector<16x128xf32>
      %93 = vector.shape_cast %92 : vector<16x128xf32> to vector<1x16x128xf32>
      %c0_69 = arith.constant 0 : index
      %94 = arith.index_cast %arg9 : i32 to index
      %c0_70 = arith.constant 0 : index
      %c0_71 = arith.constant 0 : index
      %95 = vector.load %arg6[%c0_69, %94, %c0_70, %c0_71] : memref<1x16x16x128xf32, #tpu.memory_space<vmem>>, vector<1x1x16x128xf32>
      %96 = vector.shape_cast %95 : vector<1x1x16x128xf32> to vector<1x16x128xf32>
      %97 = vector.shape_cast %93 : vector<1x16x128xf32> to vector<1x1x16x128xf32>
      tpu.vector_store %arg6[%c0_69, %94, %c0_70, %c0_71], %97 {strides = array<i32>} : memref<1x16x16x128xf32, #tpu.memory_space<vmem>>, vector<1x1x16x128xf32>,
      %c0_72 = arith.constant 0 : index
      %c0_73 = arith.constant 0 : index
      %98 = vector.load %arg7[%c0_72, %c0_73] : memref<1x128xf32, #tpu.memory_space<vmem>>, vector<1x128xf32>
      %cst_74 = arith.constant dense<0.000000e+00> : vector<128xf32>
      %99 = vector.multi_reduction <add>, %92, %cst_74 [0] : vector<16x128xf32> to vector<128xf32>
      %100 = vector.shape_cast %99 : vector<128xf32> to vector<1x128xf32>
      %101 = arith.addf %98, %100 : vector<1x128xf32>
      %c0_75 = arith.constant 0 : index
      %c0_76 = arith.constant 0 : index
      %102 = vector.load %arg7[%c0_75, %c0_76] : memref<1x128xf32, #tpu.memory_space<vmem>>, vector<1x128xf32>
      tpu.vector_store %arg7[%c0_75, %c0_76], %101 {strides = array<i32>} : memref<1x128xf32, #tpu.memory_space<vmem>>, vector<1x128xf32>,
      %c0_77 = arith.constant 0 : index
      %c0_78 = arith.constant 0 : index
      %103 = vector.load %arg8[%c0_77, %c0_78] : memref<1x128xf32, #tpu.memory_space<vmem>>, vector<1x128xf32>
      %104 = arith.mulf %92, %92 : vector<16x128xf32>
      %cst_79 = arith.constant dense<0.000000e+00> : vector<128xf32>
      %105 = vector.multi_reduction <add>, %104, %cst_79 [0] : vector<16x128xf32> to vector<128xf32>
      %106 = vector.shape_cast %105 : vector<128xf32> to vector<1x128xf32>
      %107 = arith.addf %103, %106 : vector<1x128xf32>
      %c0_80 = arith.constant 0 : index
      %c0_81 = arith.constant 0 : index
      %108 = vector.load %arg8[%c0_80, %c0_81] : memref<1x128xf32, #tpu.memory_space<vmem>>, vector<1x128xf32>
      tpu.vector_store %arg8[%c0_80, %c0_81], %107 {strides = array<i32>} : memref<1x128xf32, #tpu.memory_space<vmem>>, vector<1x128xf32>,
    }
    %c16_i32_3 = arith.constant 16 : i32
    return
  }
  func.func @transform_0(%arg0: i32, %arg1: i32, %arg2: i32) -> (i32, i32, i32, i32) {
    %c0_i32 = arith.constant 0 : i32
    %c0_i32_0 = arith.constant 0 : i32
    %c0_i32_1 = arith.constant 0 : i32
    %c0_i32_2 = arith.constant 0 : i32
    return %arg1, %c0_i32, %c0_i32_0, %c0_i32_1 : i32, i32, i32, i32
  }
  func.func @transform_1(%arg0: i32, %arg1: i32, %arg2: i32) -> (i32, i32, i32) {
    %c0_i32 = arith.constant 0 : i32
    %c0_i32_0 = arith.constant 0 : i32
    %c0_i32_1 = arith.constant 0 : i32
    return %c0_i32, %c0_i32_0, %arg0 : i32, i32, i32
  }
  func.func @transform_2(%arg0: i32, %arg1: i32, %arg2: i32) -> (i32, i32) {
    %c0_i32 = arith.constant 0 : i32
    %c0_i32_0 = arith.constant 0 : i32
    return %c0_i32, %arg0 : i32, i32
  }
  func.func @transform_3(%arg0: i32, %arg1: i32, %arg2: i32) -> (i32, i32, i32, i32) {
    %c0_i32 = arith.constant 0 : i32
    %c0_i32_0 = arith.constant 0 : i32
    return %arg1, %arg2, %c0_i32, %arg0 : i32, i32, i32, i32
  }
  func.func @transform_4(%arg0: i32, %arg1: i32, %arg2: i32) -> (i32, i32) {
    %c0_i32 = arith.constant 0 : i32
    %c0_i32_0 = arith.constant 0 : i32
    return %c0_i32, %arg0 : i32, i32
  }
  func.func @transform_5(%arg0: i32, %arg1: i32, %arg2: i32) -> (i32, i32) {
    %c0_i32 = arith.constant 0 : i32
    %c0_i32_0 = arith.constant 0 : i32
    return %c0_i32, %arg0 : i32, i32
  }
}

module attributes {stable_mosaic.version = 11 : i64} {
  func.func @_bn_relu_kernel(%arg0: i32, %arg1: i32, %arg2: i32, %arg3: memref<1x16x16x128xf32, #tpu.memory_space<vmem>>, %arg4: memref<1x128xf32, #tpu.memory_space<vmem>>, %arg5: memref<1x128xf32, #tpu.memory_space<vmem>>, %arg6: memref<1x16x16x128xf32, #tpu.memory_space<vmem>>) attributes {dimension_semantics = [#tpu.dimension_semantics<parallel>, #tpu.dimension_semantics<parallel>, #tpu.dimension_semantics<parallel>], iteration_bounds = array<i64: 2, 1, 1>, scalar_prefetch = 0 : i64, scratch_operands = 0 : i64, tpu.core_type = #tpu.core_type<tc>, window_params = [{transform_indices = @transform_0, window_bounds = array<i64: 1, 16, 16, 128>}, {transform_indices = @transform_1, window_bounds = array<i64: 1, 128>}, {transform_indices = @transform_2, window_bounds = array<i64: 1, 128>}, {transform_indices = @transform_3, window_bounds = array<i64: 1, 16, 16, 128>}]} {
    %c0 = arith.constant 0 : index
    %c0_0 = arith.constant 0 : index
    %c0_1 = arith.constant 0 : index
    %c0_2 = arith.constant 0 : index
    %0 = vector.load %arg3[%c0, %c0_0, %c0_1, %c0_2] : memref<1x16x16x128xf32, #tpu.memory_space<vmem>>, vector<1x16x16x128xf32>
    %c0_3 = arith.constant 0 : index
    %c0_4 = arith.constant 0 : index
    %1 = vector.load %arg4[%c0_3, %c0_4] : memref<1x128xf32, #tpu.memory_space<vmem>>, vector<1x128xf32>
    %2 = vector.shape_cast %1 : vector<1x128xf32> to vector<1x1x1x128xf32>
    %3 = vector.broadcast %2 : vector<1x1x1x128xf32> to vector<1x16x16x128xf32>
    %4 = arith.mulf %0, %3 : vector<1x16x16x128xf32>
    %c0_5 = arith.constant 0 : index
    %c0_6 = arith.constant 0 : index
    %5 = vector.load %arg5[%c0_5, %c0_6] : memref<1x128xf32, #tpu.memory_space<vmem>>, vector<1x128xf32>
    %6 = vector.shape_cast %5 : vector<1x128xf32> to vector<1x1x1x128xf32>
    %7 = vector.broadcast %6 : vector<1x1x1x128xf32> to vector<1x16x16x128xf32>
    %8 = arith.addf %4, %7 : vector<1x16x16x128xf32>
    %cst = arith.constant 0.000000e+00 : f32
    %9 = vector.broadcast %cst : f32 to vector<1x16x16x128xf32>
    %10 = arith.maximumf %8, %9 : vector<1x16x16x128xf32>
    %c0_7 = arith.constant 0 : index
    %c0_8 = arith.constant 0 : index
    %c0_9 = arith.constant 0 : index
    %c0_10 = arith.constant 0 : index
    %11 = vector.load %arg6[%c0_7, %c0_8, %c0_9, %c0_10] : memref<1x16x16x128xf32, #tpu.memory_space<vmem>>, vector<1x16x16x128xf32>
    tpu.vector_store %arg6[%c0_7, %c0_8, %c0_9, %c0_10], %10 {strides = array<i32>} : memref<1x16x16x128xf32, #tpu.memory_space<vmem>>, vector<1x16x16x128xf32>,
    return
  }
  func.func @transform_0(%arg0: i32, %arg1: i32, %arg2: i32) -> (i32, i32, i32, i32) {
    %c0_i32 = arith.constant 0 : i32
    %c0_i32_0 = arith.constant 0 : i32
    return %arg0, %arg1, %c0_i32, %arg2 : i32, i32, i32, i32
  }
  func.func @transform_1(%arg0: i32, %arg1: i32, %arg2: i32) -> (i32, i32) {
    %c0_i32 = arith.constant 0 : i32
    %c0_i32_0 = arith.constant 0 : i32
    return %c0_i32, %arg2 : i32, i32
  }
  func.func @transform_2(%arg0: i32, %arg1: i32, %arg2: i32) -> (i32, i32) {
    %c0_i32 = arith.constant 0 : i32
    %c0_i32_0 = arith.constant 0 : i32
    return %c0_i32, %arg2 : i32, i32
  }
  func.func @transform_3(%arg0: i32, %arg1: i32, %arg2: i32) -> (i32, i32, i32, i32) {
    %c0_i32 = arith.constant 0 : i32
    %c0_i32_0 = arith.constant 0 : i32
    return %arg0, %arg1, %c0_i32, %arg2 : i32, i32, i32, i32
  }
}

module attributes {stable_mosaic.version = 11 : i64} {
  func.func @_conv_stats_kernel(%arg0: i32, %arg1: i32, %arg2: i32, %arg3: memref<1x18x18x128xf32, #tpu.memory_space<vmem>>, %arg4: memref<9x128x128xf32, #tpu.memory_space<vmem>>, %arg5: memref<1x128xf32, #tpu.memory_space<vmem>>, %arg6: memref<1x16x16x128xf32, #tpu.memory_space<vmem>>, %arg7: memref<1x128xf32, #tpu.memory_space<vmem>>, %arg8: memref<1x128xf32, #tpu.memory_space<vmem>>) attributes {dimension_semantics = [#tpu.dimension_semantics<parallel>, #tpu.dimension_semantics<arbitrary>, #tpu.dimension_semantics<arbitrary>], iteration_bounds = array<i64: 1, 2, 1>, scalar_prefetch = 0 : i64, scratch_operands = 0 : i64, tpu.core_type = #tpu.core_type<tc>, window_params = [{transform_indices = @transform_0, window_bounds = array<i64: 1, 18, 18, 128>}, {transform_indices = @transform_1, window_bounds = array<i64: 9, 128, 128>}, {transform_indices = @transform_2, window_bounds = array<i64: 1, 128>}, {transform_indices = @transform_3, window_bounds = array<i64: 1, 16, 16, 128>}, {transform_indices = @transform_4, window_bounds = array<i64: 1, 128>}, {transform_indices = @transform_5, window_bounds = array<i64: 1, 128>}]} {
    %c0_i32 = arith.constant 0 : i32
    %0 = arith.cmpi eq, %arg1, %c0_i32 : i32
    %c0_i32_0 = arith.constant 0 : i32
    %1 = arith.cmpi eq, %arg2, %c0_i32_0 : i32
    %2 = arith.andi %0, %1 : i1
    %3 = arith.extui %2 : i1 to i32
    %c0_i32_1 = arith.constant 0 : i32
    %4 = arith.cmpi ne, %3, %c0_i32_1 : i32
    scf.if %4 {
      %cst = arith.constant 0.000000e+00 : f32
      %6 = vector.broadcast %cst : f32 to vector<1x128xf32>
      %c0 = arith.constant 0 : index
      %c0_4 = arith.constant 0 : index
      %7 = vector.load %arg7[%c0, %c0_4] : memref<1x128xf32, #tpu.memory_space<vmem>>, vector<1x128xf32>
      tpu.vector_store %arg7[%c0, %c0_4], %6 {strides = array<i32>} : memref<1x128xf32, #tpu.memory_space<vmem>>, vector<1x128xf32>,
      %cst_5 = arith.constant 0.000000e+00 : f32
      %8 = vector.broadcast %cst_5 : f32 to vector<1x128xf32>
      %c0_6 = arith.constant 0 : index
      %c0_7 = arith.constant 0 : index
      %9 = vector.load %arg8[%c0_6, %c0_7] : memref<1x128xf32, #tpu.memory_space<vmem>>, vector<1x128xf32>
      tpu.vector_store %arg8[%c0_6, %c0_7], %8 {strides = array<i32>} : memref<1x128xf32, #tpu.memory_space<vmem>>, vector<1x128xf32>,
    } else {
    }
    %c0_i32_2 = arith.constant 0 : i32
    %c16_i32 = arith.constant 16 : i32
    %5 = arith.addi %c0_i32_2, %c16_i32 : i32
    %c1_i32 = arith.constant 1 : i32
    scf.for %arg9 = %c0_i32_2 to %5 step %c1_i32  : i32 {
      %c16_i32_4 = arith.constant 16 : i32
      %6 = arith.muli %arg2, %c16_i32_4 : i32
      %7 = arith.addi %6, %arg9 : i32
      %cst = arith.constant 0.000000e+00 : f32
      %8 = vector.broadcast %cst : f32 to vector<16x128xf32>
      %c0_i32_5 = arith.constant 0 : i32
      %9 = arith.addi %7, %c0_i32_5 : i32
      %c0 = arith.constant 0 : index
      %10 = arith.index_cast %9 : i32 to index
      %c0_6 = arith.constant 0 : index
      %c0_7 = arith.constant 0 : index
      %11 = vector.load %arg3[%c0, %10, %c0_6, %c0_7] : memref<1x18x18x128xf32, #tpu.memory_space<vmem>>, vector<1x1x16x128xf32>
      %12 = vector.shape_cast %11 : vector<1x1x16x128xf32> to vector<1x16x128xf32>
      %13 = vector.shape_cast %12 : vector<1x16x128xf32> to vector<16x128xf32>
      %c0_8 = arith.constant 0 : index
      %c0_9 = arith.constant 0 : index
      %c0_10 = arith.constant 0 : index
      %14 = vector.load %arg4[%c0_8, %c0_9, %c0_10] : memref<9x128x128xf32, #tpu.memory_space<vmem>>, vector<1x128x128xf32>
      %15 = vector.shape_cast %14 : vector<1x128x128xf32> to vector<128x128xf32>
      %cst_11 = arith.constant dense<0.000000e+00> : vector<16x128xf32>
      %16 = tpu.matmul %13, %15, %cst_11 {dimension_numbers = #tpu.dot_dimension_numbers<[1], [0], [0], [1], [0, 0, 1, 1], [], []>} : vector<16x128xf32>, vector<128x128xf32>, vector<16x128xf32> -> vector<16x128xf32>
      %17 = arith.addf %8, %16 : vector<16x128xf32>
      %c0_i32_12 = arith.constant 0 : i32
      %18 = arith.addi %7, %c0_i32_12 : i32
      %c0_13 = arith.constant 0 : index
      %19 = arith.index_cast %18 : i32 to index
      %c1 = arith.constant 1 : index
      %c0_14 = arith.constant 0 : index
      %20 = vector.load %arg3[%c0_13, %19, %c1, %c0_14] : memref<1x18x18x128xf32, #tpu.memory_space<vmem>>, vector<1x1x16x128xf32>
      %21 = vector.shape_cast %20 : vector<1x1x16x128xf32> to vector<1x16x128xf32>
      %22 = vector.shape_cast %21 : vector<1x16x128xf32> to vector<16x128xf32>
      %c1_15 = arith.constant 1 : index
      %c0_16 = arith.constant 0 : index
      %c0_17 = arith.constant 0 : index
      %23 = vector.load %arg4[%c1_15, %c0_16, %c0_17] : memref<9x128x128xf32, #tpu.memory_space<vmem>>, vector<1x128x128xf32>
      %24 = vector.shape_cast %23 : vector<1x128x128xf32> to vector<128x128xf32>
      %cst_18 = arith.constant dense<0.000000e+00> : vector<16x128xf32>
      %25 = tpu.matmul %22, %24, %cst_18 {dimension_numbers = #tpu.dot_dimension_numbers<[1], [0], [0], [1], [0, 0, 1, 1], [], []>} : vector<16x128xf32>, vector<128x128xf32>, vector<16x128xf32> -> vector<16x128xf32>
      %26 = arith.addf %17, %25 : vector<16x128xf32>
      %c0_i32_19 = arith.constant 0 : i32
      %27 = arith.addi %7, %c0_i32_19 : i32
      %c0_20 = arith.constant 0 : index
      %28 = arith.index_cast %27 : i32 to index
      %c2 = arith.constant 2 : index
      %c0_21 = arith.constant 0 : index
      %29 = vector.load %arg3[%c0_20, %28, %c2, %c0_21] : memref<1x18x18x128xf32, #tpu.memory_space<vmem>>, vector<1x1x16x128xf32>
      %30 = vector.shape_cast %29 : vector<1x1x16x128xf32> to vector<1x16x128xf32>
      %31 = vector.shape_cast %30 : vector<1x16x128xf32> to vector<16x128xf32>
      %c2_22 = arith.constant 2 : index
      %c0_23 = arith.constant 0 : index
      %c0_24 = arith.constant 0 : index
      %32 = vector.load %arg4[%c2_22, %c0_23, %c0_24] : memref<9x128x128xf32, #tpu.memory_space<vmem>>, vector<1x128x128xf32>
      %33 = vector.shape_cast %32 : vector<1x128x128xf32> to vector<128x128xf32>
      %cst_25 = arith.constant dense<0.000000e+00> : vector<16x128xf32>
      %34 = tpu.matmul %31, %33, %cst_25 {dimension_numbers = #tpu.dot_dimension_numbers<[1], [0], [0], [1], [0, 0, 1, 1], [], []>} : vector<16x128xf32>, vector<128x128xf32>, vector<16x128xf32> -> vector<16x128xf32>
      %35 = arith.addf %26, %34 : vector<16x128xf32>
      %c1_i32_26 = arith.constant 1 : i32
      %36 = arith.addi %7, %c1_i32_26 : i32
      %c0_27 = arith.constant 0 : index
      %37 = arith.index_cast %36 : i32 to index
      %c0_28 = arith.constant 0 : index
      %c0_29 = arith.constant 0 : index
      %38 = vector.load %arg3[%c0_27, %37, %c0_28, %c0_29] : memref<1x18x18x128xf32, #tpu.memory_space<vmem>>, vector<1x1x16x128xf32>
      %39 = vector.shape_cast %38 : vector<1x1x16x128xf32> to vector<1x16x128xf32>
      %40 = vector.shape_cast %39 : vector<1x16x128xf32> to vector<16x128xf32>
      %c3 = arith.constant 3 : index
      %c0_30 = arith.constant 0 : index
      %c0_31 = arith.constant 0 : index
      %41 = vector.load %arg4[%c3, %c0_30, %c0_31] : memref<9x128x128xf32, #tpu.memory_space<vmem>>, vector<1x128x128xf32>
      %42 = vector.shape_cast %41 : vector<1x128x128xf32> to vector<128x128xf32>
      %cst_32 = arith.constant dense<0.000000e+00> : vector<16x128xf32>
      %43 = tpu.matmul %40, %42, %cst_32 {dimension_numbers = #tpu.dot_dimension_numbers<[1], [0], [0], [1], [0, 0, 1, 1], [], []>} : vector<16x128xf32>, vector<128x128xf32>, vector<16x128xf32> -> vector<16x128xf32>
      %44 = arith.addf %35, %43 : vector<16x128xf32>
      %c1_i32_33 = arith.constant 1 : i32
      %45 = arith.addi %7, %c1_i32_33 : i32
      %c0_34 = arith.constant 0 : index
      %46 = arith.index_cast %45 : i32 to index
      %c1_35 = arith.constant 1 : index
      %c0_36 = arith.constant 0 : index
      %47 = vector.load %arg3[%c0_34, %46, %c1_35, %c0_36] : memref<1x18x18x128xf32, #tpu.memory_space<vmem>>, vector<1x1x16x128xf32>
      %48 = vector.shape_cast %47 : vector<1x1x16x128xf32> to vector<1x16x128xf32>
      %49 = vector.shape_cast %48 : vector<1x16x128xf32> to vector<16x128xf32>
      %c4 = arith.constant 4 : index
      %c0_37 = arith.constant 0 : index
      %c0_38 = arith.constant 0 : index
      %50 = vector.load %arg4[%c4, %c0_37, %c0_38] : memref<9x128x128xf32, #tpu.memory_space<vmem>>, vector<1x128x128xf32>
      %51 = vector.shape_cast %50 : vector<1x128x128xf32> to vector<128x128xf32>
      %cst_39 = arith.constant dense<0.000000e+00> : vector<16x128xf32>
      %52 = tpu.matmul %49, %51, %cst_39 {dimension_numbers = #tpu.dot_dimension_numbers<[1], [0], [0], [1], [0, 0, 1, 1], [], []>} : vector<16x128xf32>, vector<128x128xf32>, vector<16x128xf32> -> vector<16x128xf32>
      %53 = arith.addf %44, %52 : vector<16x128xf32>
      %c1_i32_40 = arith.constant 1 : i32
      %54 = arith.addi %7, %c1_i32_40 : i32
      %c0_41 = arith.constant 0 : index
      %55 = arith.index_cast %54 : i32 to index
      %c2_42 = arith.constant 2 : index
      %c0_43 = arith.constant 0 : index
      %56 = vector.load %arg3[%c0_41, %55, %c2_42, %c0_43] : memref<1x18x18x128xf32, #tpu.memory_space<vmem>>, vector<1x1x16x128xf32>
      %57 = vector.shape_cast %56 : vector<1x1x16x128xf32> to vector<1x16x128xf32>
      %58 = vector.shape_cast %57 : vector<1x16x128xf32> to vector<16x128xf32>
      %c5 = arith.constant 5 : index
      %c0_44 = arith.constant 0 : index
      %c0_45 = arith.constant 0 : index
      %59 = vector.load %arg4[%c5, %c0_44, %c0_45] : memref<9x128x128xf32, #tpu.memory_space<vmem>>, vector<1x128x128xf32>
      %60 = vector.shape_cast %59 : vector<1x128x128xf32> to vector<128x128xf32>
      %cst_46 = arith.constant dense<0.000000e+00> : vector<16x128xf32>
      %61 = tpu.matmul %58, %60, %cst_46 {dimension_numbers = #tpu.dot_dimension_numbers<[1], [0], [0], [1], [0, 0, 1, 1], [], []>} : vector<16x128xf32>, vector<128x128xf32>, vector<16x128xf32> -> vector<16x128xf32>
      %62 = arith.addf %53, %61 : vector<16x128xf32>
      %c2_i32 = arith.constant 2 : i32
      %63 = arith.addi %7, %c2_i32 : i32
      %c0_47 = arith.constant 0 : index
      %64 = arith.index_cast %63 : i32 to index
      %c0_48 = arith.constant 0 : index
      %c0_49 = arith.constant 0 : index
      %65 = vector.load %arg3[%c0_47, %64, %c0_48, %c0_49] : memref<1x18x18x128xf32, #tpu.memory_space<vmem>>, vector<1x1x16x128xf32>
      %66 = vector.shape_cast %65 : vector<1x1x16x128xf32> to vector<1x16x128xf32>
      %67 = vector.shape_cast %66 : vector<1x16x128xf32> to vector<16x128xf32>
      %c6 = arith.constant 6 : index
      %c0_50 = arith.constant 0 : index
      %c0_51 = arith.constant 0 : index
      %68 = vector.load %arg4[%c6, %c0_50, %c0_51] : memref<9x128x128xf32, #tpu.memory_space<vmem>>, vector<1x128x128xf32>
      %69 = vector.shape_cast %68 : vector<1x128x128xf32> to vector<128x128xf32>
      %cst_52 = arith.constant dense<0.000000e+00> : vector<16x128xf32>
      %70 = tpu.matmul %67, %69, %cst_52 {dimension_numbers = #tpu.dot_dimension_numbers<[1], [0], [0], [1], [0, 0, 1, 1], [], []>} : vector<16x128xf32>, vector<128x128xf32>, vector<16x128xf32> -> vector<16x128xf32>
      %71 = arith.addf %62, %70 : vector<16x128xf32>
      %c2_i32_53 = arith.constant 2 : i32
      %72 = arith.addi %7, %c2_i32_53 : i32
      %c0_54 = arith.constant 0 : index
      %73 = arith.index_cast %72 : i32 to index
      %c1_55 = arith.constant 1 : index
      %c0_56 = arith.constant 0 : index
      %74 = vector.load %arg3[%c0_54, %73, %c1_55, %c0_56] : memref<1x18x18x128xf32, #tpu.memory_space<vmem>>, vector<1x1x16x128xf32>
      %75 = vector.shape_cast %74 : vector<1x1x16x128xf32> to vector<1x16x128xf32>
      %76 = vector.shape_cast %75 : vector<1x16x128xf32> to vector<16x128xf32>
      %c7 = arith.constant 7 : index
      %c0_57 = arith.constant 0 : index
      %c0_58 = arith.constant 0 : index
      %77 = vector.load %arg4[%c7, %c0_57, %c0_58] : memref<9x128x128xf32, #tpu.memory_space<vmem>>, vector<1x128x128xf32>
      %78 = vector.shape_cast %77 : vector<1x128x128xf32> to vector<128x128xf32>
      %cst_59 = arith.constant dense<0.000000e+00> : vector<16x128xf32>
      %79 = tpu.matmul %76, %78, %cst_59 {dimension_numbers = #tpu.dot_dimension_numbers<[1], [0], [0], [1], [0, 0, 1, 1], [], []>} : vector<16x128xf32>, vector<128x128xf32>, vector<16x128xf32> -> vector<16x128xf32>
      %80 = arith.addf %71, %79 : vector<16x128xf32>
      %c2_i32_60 = arith.constant 2 : i32
      %81 = arith.addi %7, %c2_i32_60 : i32
      %c0_61 = arith.constant 0 : index
      %82 = arith.index_cast %81 : i32 to index
      %c2_62 = arith.constant 2 : index
      %c0_63 = arith.constant 0 : index
      %83 = vector.load %arg3[%c0_61, %82, %c2_62, %c0_63] : memref<1x18x18x128xf32, #tpu.memory_space<vmem>>, vector<1x1x16x128xf32>
      %84 = vector.shape_cast %83 : vector<1x1x16x128xf32> to vector<1x16x128xf32>
      %85 = vector.shape_cast %84 : vector<1x16x128xf32> to vector<16x128xf32>
      %c8 = arith.constant 8 : index
      %c0_64 = arith.constant 0 : index
      %c0_65 = arith.constant 0 : index
      %86 = vector.load %arg4[%c8, %c0_64, %c0_65] : memref<9x128x128xf32, #tpu.memory_space<vmem>>, vector<1x128x128xf32>
      %87 = vector.shape_cast %86 : vector<1x128x128xf32> to vector<128x128xf32>
      %cst_66 = arith.constant dense<0.000000e+00> : vector<16x128xf32>
      %88 = tpu.matmul %85, %87, %cst_66 {dimension_numbers = #tpu.dot_dimension_numbers<[1], [0], [0], [1], [0, 0, 1, 1], [], []>} : vector<16x128xf32>, vector<128x128xf32>, vector<16x128xf32> -> vector<16x128xf32>
      %89 = arith.addf %80, %88 : vector<16x128xf32>
      %c0_67 = arith.constant 0 : index
      %c0_68 = arith.constant 0 : index
      %90 = vector.load %arg5[%c0_67, %c0_68] : memref<1x128xf32, #tpu.memory_space<vmem>>, vector<1x128xf32>
      %91 = vector.broadcast %90 : vector<1x128xf32> to vector<16x128xf32>
      %92 = arith.addf %89, %91 : vector<16x128xf32>
      %93 = vector.shape_cast %92 : vector<16x128xf32> to vector<1x16x128xf32>
      %c0_69 = arith.constant 0 : index
      %94 = arith.index_cast %arg9 : i32 to index
      %c0_70 = arith.constant 0 : index
      %c0_71 = arith.constant 0 : index
      %95 = vector.load %arg6[%c0_69, %94, %c0_70, %c0_71] : memref<1x16x16x128xf32, #tpu.memory_space<vmem>>, vector<1x1x16x128xf32>
      %96 = vector.shape_cast %95 : vector<1x1x16x128xf32> to vector<1x16x128xf32>
      %97 = vector.shape_cast %93 : vector<1x16x128xf32> to vector<1x1x16x128xf32>
      tpu.vector_store %arg6[%c0_69, %94, %c0_70, %c0_71], %97 {strides = array<i32>} : memref<1x16x16x128xf32, #tpu.memory_space<vmem>>, vector<1x1x16x128xf32>,
      %c0_72 = arith.constant 0 : index
      %c0_73 = arith.constant 0 : index
      %98 = vector.load %arg7[%c0_72, %c0_73] : memref<1x128xf32, #tpu.memory_space<vmem>>, vector<1x128xf32>
      %cst_74 = arith.constant dense<0.000000e+00> : vector<128xf32>
      %99 = vector.multi_reduction <add>, %92, %cst_74 [0] : vector<16x128xf32> to vector<128xf32>
      %100 = vector.shape_cast %99 : vector<128xf32> to vector<1x128xf32>
      %101 = arith.addf %98, %100 : vector<1x128xf32>
      %c0_75 = arith.constant 0 : index
      %c0_76 = arith.constant 0 : index
      %102 = vector.load %arg7[%c0_75, %c0_76] : memref<1x128xf32, #tpu.memory_space<vmem>>, vector<1x128xf32>
      tpu.vector_store %arg7[%c0_75, %c0_76], %101 {strides = array<i32>} : memref<1x128xf32, #tpu.memory_space<vmem>>, vector<1x128xf32>,
      %c0_77 = arith.constant 0 : index
      %c0_78 = arith.constant 0 : index
      %103 = vector.load %arg8[%c0_77, %c0_78] : memref<1x128xf32, #tpu.memory_space<vmem>>, vector<1x128xf32>
      %104 = arith.mulf %92, %92 : vector<16x128xf32>
      %cst_79 = arith.constant dense<0.000000e+00> : vector<128xf32>
      %105 = vector.multi_reduction <add>, %104, %cst_79 [0] : vector<16x128xf32> to vector<128xf32>
      %106 = vector.shape_cast %105 : vector<128xf32> to vector<1x128xf32>
      %107 = arith.addf %103, %106 : vector<1x128xf32>
      %c0_80 = arith.constant 0 : index
      %c0_81 = arith.constant 0 : index
      %108 = vector.load %arg8[%c0_80, %c0_81] : memref<1x128xf32, #tpu.memory_space<vmem>>, vector<1x128xf32>
      tpu.vector_store %arg8[%c0_80, %c0_81], %107 {strides = array<i32>} : memref<1x128xf32, #tpu.memory_space<vmem>>, vector<1x128xf32>,
    }
    %c16_i32_3 = arith.constant 16 : i32
    return
  }
  func.func @transform_0(%arg0: i32, %arg1: i32, %arg2: i32) -> (i32, i32, i32, i32) {
    %c0_i32 = arith.constant 0 : i32
    %c0_i32_0 = arith.constant 0 : i32
    %c0_i32_1 = arith.constant 0 : i32
    %c0_i32_2 = arith.constant 0 : i32
    return %arg1, %c0_i32, %c0_i32_0, %c0_i32_1 : i32, i32, i32, i32
  }
  func.func @transform_1(%arg0: i32, %arg1: i32, %arg2: i32) -> (i32, i32, i32) {
    %c0_i32 = arith.constant 0 : i32
    %c0_i32_0 = arith.constant 0 : i32
    %c0_i32_1 = arith.constant 0 : i32
    return %c0_i32, %c0_i32_0, %arg0 : i32, i32, i32
  }
  func.func @transform_2(%arg0: i32, %arg1: i32, %arg2: i32) -> (i32, i32) {
    %c0_i32 = arith.constant 0 : i32
    %c0_i32_0 = arith.constant 0 : i32
    return %c0_i32, %arg0 : i32, i32
  }
  func.func @transform_3(%arg0: i32, %arg1: i32, %arg2: i32) -> (i32, i32, i32, i32) {
    %c0_i32 = arith.constant 0 : i32
    %c0_i32_0 = arith.constant 0 : i32
    return %arg1, %arg2, %c0_i32, %arg0 : i32, i32, i32, i32
  }
  func.func @transform_4(%arg0: i32, %arg1: i32, %arg2: i32) -> (i32, i32) {
    %c0_i32 = arith.constant 0 : i32
    %c0_i32_0 = arith.constant 0 : i32
    return %c0_i32, %arg0 : i32, i32
  }
  func.func @transform_5(%arg0: i32, %arg1: i32, %arg2: i32) -> (i32, i32) {
    %c0_i32 = arith.constant 0 : i32
    %c0_i32_0 = arith.constant 0 : i32
    return %c0_i32, %arg0 : i32, i32
  }
}

</mosaic_0001>

<bundles_post_ra>
// kernel: double_conv.5
= control target key start
LH: loop header
LB: loop body
LE: loop exit
PB: predicated region body
PF: predicated region fallthrough
CT: control target
= control target key end

     0   :  { %s664_s12 = smov 0   ;;  %s666_s13 = smov 0   ;;  %s839_s0 = inlined_call_operand.vmem [shape: f32[2,16,16,128], index: 0, kind: input, shape index: {}]   ;;  %s840_s1 = inlined_call_operand.vmem [shape: f32[1,128], index: 1, kind: input, shape index: {}]   ;;  %s841_s2 = inlined_call_operand.vmem [shape: f32[1,128], index: 2, kind: input, shape index: {}]   ;;  %s842_s3 = inlined_call_operand.vmem [shape: f32[2,16,16,128], index: 3, kind: output, shape index: {}]  }
   0x1   :  { %s668_s14 = smov 0  }
   0x2 LB: > { %s32_s15 = sadd.s32 1, %s638_s13  ;;  %p585_p0 = scmp.ge.s32.totalorder %s642_s14, 1  ;;  %s642_s14 = sphi %s668_s14, %s13_s14   ;;  %s638_s13 = sphi %s666_s13, %s844_s13   ;;  %s634_s12 = sphi %s664_s12, %s843_s12  }
   0x3   : > { %p34_p1 = scmp.ge.s32.totalorder %s32_s15, 2  ;;  %p189_p2 = scmp.lt.s32.totalorder %s642_s14, 3 }
   0x5   : > { %s846_s15 = smov (%p34_p1, %s32_s15), 0  ;;  %p190_p3 = pnand %p585_p0, %p189_p2 }
   0x6   : > { %p236_p4 = scmp.lt.s32.totalorder (!%p190_p3), %s634_s12, 1 }
   0x7   : > { %193 = sbr.rel (%p190_p3) target bundleno = 45 (0x2d), region = 32 }
   0xc   : > { %s848_s12 = smov (!%p236_p4, %s634_s12), 1  ;;  %v685_v0 = vld [vmem:[%s840_s1] ss:$0 sm:$0xff] }
   0xd   : > { %s594_s16 = sshll.u32 %s848_s12, 8  ;;  %v695_v1 = vld [vmem:[%s841_s2] ss:$0 sm:$0xff] }
   0xe   : > { %s690_s21 = scalar_lea.vmem %s839_s0, %s594_s16  ;;  %s718_s26 = scalar_lea.vmem %s842_s3, %s594_s16 }
   0xf   : > { %v269_v2 = vld [vmem:[%s690_s21] sm:$0xff]  ;;  %v270_v3 = vld [vmem:[%s690_s21 + $0x8] sm:$0xff]  ;;  %v271_v4 = vld [vmem:[%s690_s21 + $0x10] sm:$0xff] }
  0x10   : > { %v308_v5 = vmul.f32 %v685_v0, %v269_v2  ;;  %v309_v6 = vmul.f32 %v685_v0, %v270_v3  ;;  %v310_v7 = vmul.f32 %v685_v0, %v271_v4  ;;  %v272_v8 = vld [vmem:[%s690_s21 + $0x18] sm:$0xff]  ;;  %v273_v9 = vld [vmem:[%s690_s21 + $0x20] sm:$0xff]  ;;  %v274_v10 = vld [vmem:[%s690_s21 + $0x28] sm:$0xff] }
  0x11   : > { %v311_v11 = vmul.f32 %v685_v0, %v272_v8  ;;  %v312_v12 = vmul.f32 %v685_v0, %v273_v9  ;;  %v313_v13 = vmul.f32 %v685_v0, %v274_v10  ;;  %v275_v14 = vld [vmem:[%s690_s21 + $0x30] sm:$0xff]  ;;  %v276_v15 = vld [vmem:[%s690_s21 + $0x38] sm:$0xff]  ;;  %v277_v24 = vld [vmem:[%s690_s21 + $0x40] sm:$0xff] }
  0x12   : > { %v347_v16 = vadd.f32 %v695_v1, %v308_v5  ;;  %v348_v17 = vadd.f32 %v695_v1, %v309_v6  ;;  %v349_v18 = vadd.f32 %v695_v1, %v310_v7  ;;  %v314_v19 = vmul.f32 %v685_v0, %v275_v14  ;;  %v278_v25 = vld [vmem:[%s690_s21 + $0x48] sm:$0xff]  ;;  %v279_v26 = vld [vmem:[%s690_s21 + $0x50] sm:$0xff]  ;;  %v280_v31 = vld [vmem:[%s690_s21 + $0x58] sm:$0xff] }
  0x13   : > { %v350_v20 = vadd.f32 %v695_v1, %v311_v11  ;;  %v351_v21 = vadd.f32 %v695_v1, %v312_v12  ;;  %v352_v22 = vadd.f32 %v695_v1, %v313_v13  ;;  %v315_v23 = vmul.f32 %v685_v0, %v276_v15  ;;  %v281_v32 = vld [vmem:[%s690_s21 + $0x60] sm:$0xff]  ;;  %v282_v33 = vld [vmem:[%s690_s21 + $0x68] sm:$0xff]  ;;  %v283_v38 = vld [vmem:[%s690_s21 + $0x70] sm:$0xff] }
  0x14   : > { %v379_v27 = vmax.f32 %v347_v16, 0.0  ;;  %v380_v28 = vmax.f32 %v348_v17, 0.0  ;;  %v381_v29 = vmax.f32 %v349_v18, 0.0  ;;  %v353_v30 = vadd.f32 %v695_v1, %v314_v19  ;;  %v284_v43 = vld [vmem:[%s690_s21 + $0x78] sm:$0xff]  ;;  %v285_v56 = vld [vmem:[%s690_s21 + $0x80] sm:$0xff]  ;;  %v286_v57 = vld [vmem:[%s690_s21 + $0x88] sm:$0xff] }
  0x15   : > { %v382_v34 = vmax.f32 %v350_v20, 0.0  ;;  %v383_v35 = vmax.f32 %v351_v21, 0.0  ;;  %v384_v36 = vmax.f32 %v352_v22, 0.0  ;;  %v354_v37 = vadd.f32 %v695_v1, %v315_v23  ;;  %v287_v58 = vld [vmem:[%s690_s21 + $0x90] sm:$0xff]  ;;  %v288_v63 = vld [vmem:[%s690_s21 + $0x98] sm:$0xff]  ;;  %v289_v2 = vld [vmem:[%s690_s21 + $0xa0] sm:$0xff] }
  0x16   : > { %411 = vst [vmem:[%s718_s26] sm:$0xff] %v379_v27  ;;  %412 = vst [vmem:[%s718_s26 + $0x8] sm:$0xff] %v380_v28  ;;  %v385_v39 = vmax.f32 %v353_v30, 0.0  ;;  %v316_v40 = vmul.f32 %v685_v0, %v277_v24  ;;  %v317_v41 = vmul.f32 %v685_v0, %v278_v25  ;;  %v318_v42 = vmul.f32 %v685_v0, %v279_v26  ;;  %v290_v3 = vld [vmem:[%s690_s21 + $0xa8] sm:$0xff]  ;;  %v291_v8 = vld [vmem:[%s690_s21 + $0xb0] sm:$0xff] }
  0x17   : > { %413 = vst [vmem:[%s718_s26 + $0x10] sm:$0xff] %v381_v29  ;;  %414 = vst [vmem:[%s718_s26 + $0x18] sm:$0xff] %v382_v34  ;;  %v386_v44 = vmax.f32 %v354_v37, 0.0  ;;  %v319_v45 = vmul.f32 %v685_v0, %v280_v31  ;;  %v320_v46 = vmul.f32 %v685_v0, %v281_v32  ;;  %v321_v47 = vmul.f32 %v685_v0, %v282_v33  ;;  %v292_v13 = vld [vmem:[%s690_s21 + $0xb8] sm:$0xff]  ;;  %v293_v26 = vld [vmem:[%s690_s21 + $0xc0] sm:$0xff] }
  0x18   : > { %415 = vst [vmem:[%s718_s26 + $0x20] sm:$0xff] %v383_v35  ;;  %416 = vst [vmem:[%s718_s26 + $0x28] sm:$0xff] %v384_v36  ;;  %v355_v48 = vadd.f32 %v695_v1, %v316_v40  ;;  %v356_v49 = vadd.f32 %v695_v1, %v317_v41  ;;  %v357_v50 = vadd.f32 %v695_v1, %v318_v42  ;;  %v294_v27 = vld [vmem:[%s690_s21 + $0xc8] sm:$0xff]  ;;  %v295_v28 = vld [vmem:[%s690_s21 + $0xd0] sm:$0xff] }
  0x19   : > { %417 = vst [vmem:[%s718_s26 + $0x30] sm:$0xff] %v385_v39  ;;  %v322_v51 = vmul.f32 %v685_v0, %v283_v38  ;;  %418 = vst [vmem:[%s718_s26 + $0x38] sm:$0xff] %v386_v44  ;;  %v358_v52 = vadd.f32 %v695_v1, %v319_v45  ;;  %v359_v53 = vadd.f32 %v695_v1, %v320_v46  ;;  %v296_v33 = vld [vmem:[%s690_s21 + $0xd8] sm:$0xff]  ;;  %v297_v34 = vld [vmem:[%s690_s21 + $0xe0] sm:$0xff] }
  0x1a   : > { %v360_v54 = vadd.f32 %v695_v1, %v321_v47  ;;  %v323_v55 = vmul.f32 %v685_v0, %v284_v43  ;;  %v387_v59 = vmax.f32 %v355_v48, 0.0  ;;  %v388_v60 = vmax.f32 %v356_v49, 0.0  ;;  %v298_v35 = vld [vmem:[%s690_s21 + $0xe8] sm:$0xff]  ;;  %v299_v40 = vld [vmem:[%s690_s21 + $0xf0] sm:$0xff]  ;;  %v300_v45 = vld [vmem:[%s690_s21 + $0xf8] sm:$0xff] }
  0x1b   : > { %v389_v61 = vmax.f32 %v357_v50, 0.0  ;;  %v361_v62 = vadd.f32 %v695_v1, %v322_v51  ;;  %v390_v4 = vmax.f32 %v358_v52, 0.0  ;;  %v391_v5 = vmax.f32 %v359_v53, 0.0 }
  0x1c   : > { %v392_v6 = vmax.f32 %v360_v54, 0.0  ;;  %v362_v7 = vadd.f32 %v695_v1, %v323_v55  ;;  %419 = vst [vmem:[%s718_s26 + $0x40] sm:$0xff] %v387_v59  ;;  %420 = vst [vmem:[%s718_s26 + $0x48] sm:$0xff] %v388_v60  ;;  %v324_v10 = vmul.f32 %v685_v0, %v285_v56  ;;  %v325_v11 = vmul.f32 %v685_v0, %v286_v57 }
  0x1d   : > { %421 = vst [vmem:[%s718_s26 + $0x50] sm:$0xff] %v389_v61  ;;  %v393_v9 = vmax.f32 %v361_v62, 0.0  ;;  %v326_v12 = vmul.f32 %v685_v0, %v287_v58  ;;  %422 = vst [vmem:[%s718_s26 + $0x58] sm:$0xff] %v390_v4  ;;  %v327_v15 = vmul.f32 %v685_v0, %v288_v63  ;;  %v328_v16 = vmul.f32 %v685_v0, %v289_v2 }
  0x1e   : > { %423 = vst [vmem:[%s718_s26 + $0x60] sm:$0xff] %v391_v5  ;;  %424 = vst [vmem:[%s718_s26 + $0x68] sm:$0xff] %v392_v6  ;;  %v394_v14 = vmax.f32 %v362_v7, 0.0  ;;  %v329_v17 = vmul.f32 %v685_v0, %v290_v3  ;;  %v363_v18 = vadd.f32 %v695_v1, %v324_v10  ;;  %v364_v19 = vadd.f32 %v695_v1, %v325_v11 }
  0x1f   : > { %425 = vst [vmem:[%s718_s26 + $0x70] sm:$0xff] %v393_v9  ;;  %v365_v20 = vadd.f32 %v695_v1, %v326_v12  ;;  %v330_v21 = vmul.f32 %v685_v0, %v291_v8  ;;  %v366_v22 = vadd.f32 %v695_v1, %v327_v15  ;;  %v367_v23 = vadd.f32 %v695_v1, %v328_v16 }
  0x20   : > { %426 = vst [vmem:[%s718_s26 + $0x78] sm:$0xff] %v394_v14  ;;  %v368_v24 = vadd.f32 %v695_v1, %v329_v17  ;;  %v331_v25 = vmul.f32 %v685_v0, %v292_v13  ;;  %v395_v29 = vmax.f32 %v363_v18, 0.0  ;;  %v396_v30 = vmax.f32 %v364_v19, 0.0 }
  0x21   : > { %v397_v31 = vmax.f32 %v365_v20, 0.0  ;;  %v369_v32 = vadd.f32 %v695_v1, %v330_v21  ;;  %v398_v36 = vmax.f32 %v366_v22, 0.0  ;;  %v399_v37 = vmax.f32 %v367_v23, 0.0 }
  0x22   : > { %v400_v38 = vmax.f32 %v368_v24, 0.0  ;;  %v370_v39 = vadd.f32 %v695_v1, %v331_v25  ;;  %427 = vst [vmem:[%s718_s26 + $0x80] sm:$0xff] %v395_v29  ;;  %428 = vst [vmem:[%s718_s26 + $0x88] sm:$0xff] %v396_v30  ;;  %v332_v42 = vmul.f32 %v685_v0, %v293_v26  ;;  %v333_v43 = vmul.f32 %v685_v0, %v294_v27 }
  0x23   : > { %429 = vst [vmem:[%s718_s26 + $0x90] sm:$0xff] %v397_v31  ;;  %v401_v41 = vmax.f32 %v369_v32, 0.0  ;;  %v334_v44 = vmul.f32 %v685_v0, %v295_v28  ;;  %430 = vst [vmem:[%s718_s26 + $0x98] sm:$0xff] %v398_v36  ;;  %v335_v47 = vmul.f32 %v685_v0, %v296_v33  ;;  %v336_v48 = vmul.f32 %v685_v0, %v297_v34 }
  0x24   : > { %431 = vst [vmem:[%s718_s26 + $0xa0] sm:$0xff] %v399_v37  ;;  %432 = vst [vmem:[%s718_s26 + $0xa8] sm:$0xff] %v400_v38  ;;  %v402_v46 = vmax.f32 %v370_v39, 0.0  ;;  %v337_v49 = vmul.f32 %v685_v0, %v298_v35  ;;  %v371_v50 = vadd.f32 %v695_v1, %v332_v42  ;;  %v372_v51 = vadd.f32 %v695_v1, %v333_v43 }
  0x25   : > { %433 = vst [vmem:[%s718_s26 + $0xb0] sm:$0xff] %v401_v41  ;;  %v373_v52 = vadd.f32 %v695_v1, %v334_v44  ;;  %v338_v53 = vmul.f32 %v685_v0, %v299_v40  ;;  %v374_v54 = vadd.f32 %v695_v1, %v335_v47  ;;  %v375_v55 = vadd.f32 %v695_v1, %v336_v48 }
  0x26   : > { %434 = vst [vmem:[%s718_s26 + $0xb8] sm:$0xff] %v402_v46  ;;  %v376_v56 = vadd.f32 %v695_v1, %v337_v49  ;;  %v339_v57 = vmul.f32 %v685_v0, %v300_v45  ;;  %v403_v58 = vmax.f32 %v371_v50, 0.0  ;;  %v404_v59 = vmax.f32 %v372_v51, 0.0 }
  0x27   : > { %v405_v60 = vmax.f32 %v373_v52, 0.0  ;;  %v377_v61 = vadd.f32 %v695_v1, %v338_v53  ;;  %v406_v62 = vmax.f32 %v374_v54, 0.0  ;;  %v407_v63 = vmax.f32 %v375_v55, 0.0 }
  0x28   : > { %v408_v2 = vmax.f32 %v376_v56, 0.0  ;;  %v378_v3 = vadd.f32 %v695_v1, %v339_v57  ;;  %435 = vst [vmem:[%s718_s26 + $0xc0] sm:$0xff] %v403_v58  ;;  %436 = vst [vmem:[%s718_s26 + $0xc8] sm:$0xff] %v404_v59 }
  0x29   : > { %437 = vst [vmem:[%s718_s26 + $0xd0] sm:$0xff] %v405_v60  ;;  %v409_v4 = vmax.f32 %v377_v61, 0.0  ;;  %438 = vst [vmem:[%s718_s26 + $0xd8] sm:$0xff] %v406_v62 }
  0x2a   : > { %439 = vst [vmem:[%s718_s26 + $0xe0] sm:$0xff] %v407_v63  ;;  %440 = vst [vmem:[%s718_s26 + $0xe8] sm:$0xff] %v408_v2  ;;  %v410_v0 = vmax.f32 %v378_v3, 0.0 }
  0x2b   : > { %441 = vst [vmem:[%s718_s26 + $0xf0] sm:$0xff] %v409_v4 }
  0x2c   : > { %442 = vst [vmem:[%s718_s26 + $0xf8] sm:$0xff] %v410_v0 }
  0x2d PF: > { %s13_s14 = sadd.s32 1, %s642_s14   ;;  %s843_s12 = smov %s638_s13 }
  0x2e   : > { %p10_p5 = scmp.ge.s32.totalorder %s13_s14, 4   ;;  %s844_s13 = smov %s846_s15 }
  0x30   :  { %12 = sbr.rel (!%p10_p5) target bundleno = 2 (0x2), region = 68 }

// kernel: double_conv.4
= control target key start
LH: loop header
LB: loop body
LE: loop exit
PB: predicated region body
PF: predicated region fallthrough
CT: control target
= control target key end

     0   :  { %s1606_s18 = smov 0   ;;  %s1608_s19 = smov 0   ;;  %s1759_s0 = inlined_call_operand.vmem [shape: f32[2,18,18,4], index: 0, kind: input, shape index: {}]   ;;  %s1760_s1 = inlined_call_operand.vmem [shape: f32[9,4,128], index: 1, kind: input, shape index: {}]   ;;  %s1761_s2 = inlined_call_operand.vmem [shape: f32[1,128], index: 2, kind: input, shape index: {}]   ;;  %s1762_s3 = inlined_call_operand.vmem [shape: f32[2,16,16,128], index: 3, kind: output, shape index: {0}]   ;;  %s1763_s4 = inlined_call_operand.vmem [shape: f32[1,128], index: 4, kind: output, shape index: {1}]   ;;  %s1764_s5 = inlined_call_operand.vmem [shape: f32[1,128], index: 5, kind: output, shape index: {2}]  }
   0x1   :  { %s1610_s20 = smov 0  }
   0x2 LB: > { %s31_s21 = sadd.s32 1, %s1565_s19  ;;  %p1377_p0 = scmp.ge.s32.totalorder %s1569_s20, 1  ;;  %s1569_s20 = sphi %s1610_s20, %s16_s20   ;;  %s1565_s19 = sphi %s1608_s19, %s1766_s19   ;;  %s1561_s18 = sphi %s1606_s18, %s1765_s18  }
   0x3   : > { %p33_p1 = scmp.ge.s32.totalorder %s31_s21, 2  ;;  %p232_p2 = scmp.lt.s32.totalorder %s1569_s20, 3 }
   0x5   : > { %s1768_s21 = smov (%p33_p1, %s31_s21), 0  ;;  %p233_p3 = pnand %p1377_p0, %p232_p2 }
   0x6   : > { %p281_p4 = scmp.lt.s32.totalorder (!%p233_p3), %s1561_s18, 1  ;;  %p313_p5 = scmp.eq.s32.totalorder (!%p233_p3), %s1561_s18, 0 }
   0x7   : > { %236 = sbr.rel (%p233_p3) target bundleno = 257 (0x101), region = 32 }
   0xc   : > { %s1770_s18 = smov (!%p281_p4, %s1561_s18), 1  ;;  %318 = sbr.rel (!%p313_p5) target bundleno = 17 (0x11), region = 36  ;;  %v1575_v0 = vmov (%p313_p5), 0.0  }
   0xd   : > { %s1509_s22 = smul.u32 432, %s1770_s18  ;;  %s1435_s23 = sshll.u32 %s1770_s18, 8  ;;  %319 = vst [vmem:[%s1763_s4] sm:$0x1] (%p313_p5), %v1575_v0  ;;  %320 = vst [vmem:[%s1764_s5] sm:$0x1] (%p313_p5), %v1575_v0 }
   0xe   : > { %s1627_s26 = scalar_lea.vmem %s1762_s3, %s1435_s23 }
   0xf   : > { %s1632_s29 = scalar_lea.vmem %s1759_s0, %s1509_s22 }
  0x11 PF: > { %s1640_s9 = smov 0  }
  0x12 LB: >> { %v1382_v1 = vld [vmem:[%s1760_s1 + $0x4] sm:$0xf]  ;;  %vm345_vm0 = vcmask 1043456   ;;  %v333_v2 = vld [vmem:[%s1760_s1] sm:$0xf]  ;;  %s329_s18 = smul.u32 24, %s1573_s9  ;;  %s1573_s9 = sphi %s1640_s9, %s326_s9  }
  0x13   : >> { %1464 = vmatprep.subr.msk.mxu0 %vm345_vm0, %v1382_v1  ;;  %1469 = vmatprep.subr.msk.mxu1 %vm345_vm0, %v333_v2  ;;  %v1389_v3 = vld [vmem:[%s1760_s1 + $0x8] sm:$0xf]  ;;  %v1395_v4 = vld [vmem:[%s1760_s1 + $0xc] sm:$0xf]  ;;  %vm338_vm1 = vcmask 31744   ;;  %s1430_s11 = sshll.u32 %s1573_s9, 4 }
  0x14   : >> { %1465 = vmatpush3.msk.msra.mxu0 %vm345_vm0, %v1382_v1  ;;  %1470 = vmatpush3.msk.msra.mxu1 %vm345_vm0, %v333_v2  ;;  %s1665_s22 = scalar_lea.vmem %s1632_s29, %s329_s18  ;;  %v1401_v11 = vld [vmem:[%s1760_s1 + $0x10] sm:$0xf]  ;;  %v1407_v12 = vld [vmem:[%s1760_s1 + $0x14] sm:$0xf]  ;;  %v1413_v17 = vld [vmem:[%s1760_s1 + $0x18] sm:$0xf]  ;;  %s1154_s14 = scalar_lea.vmem %s1627_s26, %s1430_s11 }
  0x15   : >> { %1474 = vmatprep.subr.msk.mxu0 %vm345_vm0, %v1389_v3  ;;  %1479 = vmatprep.subr.msk.mxu1 %vm345_vm0, %v1395_v4  ;;  %v334_v5 = vld [vmem:[%s1665_s22 + $0x1] sm:$0xff]  ;;  %v335_v7 = vld [vmem:[%s1665_s22 + $0x9] sm:$0xff]  ;;  %v1393_v10 = vld [vmem:[%s1665_s22 + $0x18] sm:$0xff]  ;;  %s326_s9 = sadd.s32 1, %s1573_s9  }
  0x16   : >> { %v331_v6 = vld [vmem:[%s1665_s22] sm:$0xff]  ;;  %1466 = vmatprep.mubr.msk.f32.mxu0 %vm338_vm1, %v334_v5  ;;  %v332_v8 = vld [vmem:[%s1665_s22 + $0x8] sm:$0xff]  ;;  %v1419_v18 = vld [vmem:[%s1760_s1 + $0x1c] sm:$0xf]  ;;  %p323_p6 = scmp.ge.s32.totalorder %s326_s9, 16  }
  0x17   : >> { %1471 = vmatprep.mubr.msk.f32.mxu1 %vm338_vm1, %v331_v6  ;;  %v508_v9 = vld [vmem:[%s1665_s22 + $0x2] sm:$0xff]  ;;  %1467 = vmatmul.mubr.msk.f32.vlgmr.msra.gmra.mxu0 %vm338_vm1, %v335_v7  ;;  %v509_v13 = vld [vmem:[%s1665_s22 + $0xa] sm:$0xff]  ;;  %v1399_v15 = vld [vmem:[%s1665_s22 + $0x19] sm:$0xff] }
  0x18   : >> { %1472 = vmatmul.mubr.msk.f32.vlgmr.msra.gmra.mxu1 %vm338_vm1, %v332_v8  ;;  %1475 = vmatpush3.msk.msra.mxu0 %vm345_vm0, %v1389_v3  ;;  %v1394_v14 = vld [vmem:[%s1665_s22 + $0x20] sm:$0xff]  ;;  %v1411_v21 = vld [vmem:[%s1665_s22 + $0x30] sm:$0xff]  ;;  %v1412_v24 = vld [vmem:[%s1665_s22 + $0x38] sm:$0xff] }
  0x19   : >> { %1480 = vmatpush3.msk.msra.mxu1 %vm345_vm0, %v1395_v4  ;;  %1476 = vmatprep.mubr.msk.f32.mxu0 %vm338_vm1, %v508_v9  ;;  %v1405_v16 = vld [vmem:[%s1665_s22 + $0x1a] sm:$0xff]  ;;  %v1406_v20 = vld [vmem:[%s1665_s22 + $0x22] sm:$0xff]  ;;  %v1417_v22 = vld [vmem:[%s1665_s22 + $0x31] sm:$0xff] }
  0x1a   : >> { %1481 = vmatprep.mubr.msk.f32.mxu1 %vm338_vm1, %v1393_v10  ;;  %1484 = vmatprep.subr.msk.mxu0 %vm345_vm0, %v1401_v11  ;;  %v1400_v19 = vld [vmem:[%s1665_s22 + $0x21] sm:$0xff]  ;;  %v1418_v25 = vld [vmem:[%s1665_s22 + $0x39] sm:$0xff] }
  0x1b   : >> { %1489 = vmatprep.subr.msk.mxu1 %vm345_vm0, %v1407_v12  ;;  %1477 = vmatmul.mubr.msk.f32.vlgmr.msra.gmra.mxu0 %vm338_vm1, %v509_v13  ;;  %v1425_v23 = vld [vmem:[%s1760_s1 + $0x20] sm:$0xf]  ;;  %v1423_v26 = vld [vmem:[%s1665_s22 + $0x32] sm:$0xff] }
  0x1c   : >> { %1482 = vmatmul.mubr.msk.f32.vlgmr.msra.gmra.mxu1 %vm338_vm1, %v1394_v14  ;;  %1485 = vmatpush3.msk.msra.mxu0 %vm345_vm0, %v1401_v11  ;;  %v1424_v27 = vld [vmem:[%s1665_s22 + $0x3a] sm:$0xff] }
  0x1d   : >> { %1490 = vmatpush3.msk.msra.mxu1 %vm345_vm0, %v1407_v12  ;;  %1486 = vmatprep.mubr.msk.f32.mxu0 %vm338_vm1, %v1399_v15  ;;  %v1429_v58 = vld [vmem:[%s1761_s2] ss:$0 sm:$0xff] }
  0x1e   : >> { %1491 = vmatprep.mubr.msk.f32.mxu1 %vm338_vm1, %v1405_v16  ;;  %1494 = vmatprep.subr.msk.mxu0 %vm345_vm0, %v1413_v17  ;;  %v1157_v14 = vld [vmem:[%s1763_s4] sm:$0x1] }
  0x1f   : >> { %1499 = vmatprep.subr.msk.mxu1 %vm345_vm0, %v1419_v18  ;;  %1487 = vmatmul.mubr.msk.f32.vlgmr.msra.gmra.mxu0 %vm338_vm1, %v1400_v19 }
  0x20   : >> { %1492 = vmatmul.mubr.msk.f32.vlgmr.msra.gmra.mxu1 %vm338_vm1, %v1406_v20  ;;  %1495 = vmatpush3.msk.msra.mxu0 %vm345_vm0, %v1413_v17  ;;  %v1167_v17 = vld [vmem:[%s1764_s5] sm:$0x1] }
  0x21   : >> { %1500 = vmatpush3.msk.msra.mxu1 %vm345_vm0, %v1419_v18  ;;  %1496 = vmatprep.mubr.msk.f32.mxu0 %vm338_vm1, %v1411_v21 }
  0x22   : >> { %1501 = vmatprep.mubr.msk.f32.mxu1 %vm338_vm1, %v1417_v22  ;;  %1504 = vmatprep.subr.msk.mxu0 %vm345_vm0, %v1425_v23 }
  0x23   : >> { %1497 = vmatmul.mubr.msk.f32.vlgmr.msra.gmra.mxu0 %vm338_vm1, %v1412_v24 }
  0x24   : >> { %1502 = vmatmul.mubr.msk.f32.vlgmr.msra.gmra.mxu1 %vm338_vm1, %v1418_v25  ;;  %1505 = vmatpush3.msk.msra.mxu0 %vm345_vm0, %v1425_v23 }
  0x25   : >> { %1506 = vmatprep.mubr.msk.f32.mxu0 %vm338_vm1, %v1423_v26 }
  0x27   : >> { %1507 = vmatmul.mubr.msk.f32.vlgmr.msra.gmra.mxu0 %vm338_vm1, %v1424_v27 }
  0xd7   : >> { %v1468_v28 = vpop.f32.mrf.mxu0 }
  0xd8   : >> { %v1473_v29 = vpop.f32.mrf.mxu1 }
  0xd9   : >> { %v415_v30 = vpop.f32.mrf.mxu0  ;;  %v505_v32 = vadd.f32 %v1473_v29, %v1468_v28 }
  0xda   : >> { %v499_v31 = vpop.f32.mrf.mxu1 }
  0xdb   : >> { %v1478_v33 = vpop.f32.mrf.mxu0  ;;  %v500_v35 = vadd.f32 %v499_v31, %v415_v30 }
  0xdc   : >> { %v1483_v34 = vpop.f32.mrf.mxu1  ;;  %v597_v36 = vadd.f32 %v1478_v33, %v505_v32 }
  0xdd   : >> { %v587_v37 = vpop.f32.mrf.mxu0 }
  0xde   : >> { %v680_v38 = vpop.f32.mrf.mxu1  ;;  %v690_v39 = vadd.f32 %v1483_v34, %v597_v36  ;;  %v596_v40 = vadd.f32 %v587_v37, %v500_v35 }
  0xdf   : >> { %v1488_v41 = vpop.f32.mrf.mxu0 }
  0xe0   : >> { %v1493_v42 = vpop.f32.mrf.mxu1  ;;  %v689_v43 = vadd.f32 %v680_v38, %v596_v40  ;;  %v780_v44 = vadd.f32 %v1488_v41, %v690_v39 }
  0xe1   : >> { %v770_v45 = vpop.f32.mrf.mxu0 }
  0xe2   : >> { %v860_v46 = vpop.f32.mrf.mxu1  ;;  %v870_v47 = vadd.f32 %v1493_v42, %v780_v44  ;;  %v779_v48 = vadd.f32 %v770_v45, %v689_v43 }
  0xe3   : >> { %v1498_v49 = vpop.f32.mrf.mxu0 }
  0xe4   : >> { %v1503_v50 = vpop.f32.mrf.mxu1  ;;  %v869_v51 = vadd.f32 %v860_v46, %v779_v48  ;;  %v963_v52 = vadd.f32 %v1498_v49, %v870_v47 }
  0xe5   : >> { %v953_v53 = vpop.f32.mrf.mxu0 }
  0xe6   : >> { %v1053_v54 = vadd.f32 %v1503_v50, %v963_v52  ;;  %v962_v55 = vadd.f32 %v953_v53, %v869_v51  ;;  %v1043_v56 = vpop.f32.mrf.mxu1 }
  0xe7   : >> { %v1508_v57 = vpop.f32.mrf.mxu0 }
  0xe8   : >> { %v1052_v59 = vadd.f32 %v1043_v56, %v962_v55  ;;  %v1143_v60 = vadd.f32 %v1508_v57, %v1053_v54 }
  0xe9   : >> { %v1133_v61 = vpop.f32.mrf.mxu0 }
  0xea   : >> { %v1152_v62 = vadd.f32 %v1429_v58, %v1143_v60  ;;  %v1142_v63 = vadd.f32 %v1133_v61, %v1052_v59 }
  0xec   : >> { %1156 = vst [vmem:[%s1154_s14 + $0x8] sm:$0xff] %v1152_v62  ;;  %v1151_v0 = vadd.f32 %v1429_v58, %v1142_v63  ;;  %v1169_v1 = vmul.f32 %v1152_v62, %v1152_v62 }
  0xee   : >> { %1155 = vst [vmem:[%s1154_s14] sm:$0xff] %v1151_v0  ;;  %v1158_v2 = vadd.f32 %v1152_v62, %v1151_v0  ;;  %v1168_v3 = vmul.f32 %v1151_v0, %v1151_v0 }
  0xf0   : >> { %v1159_v4 = vrot.slane %v1158_v2, 4  ;;  %v1170_v5 = vadd.f32 %v1169_v1, %v1168_v3 }
  0xf2   : >> { %v1160_v6 = vadd.f32 %v1159_v4, %v1158_v2  ;;  %v1171_v7 = vrot.slane %v1170_v5, 4 }
  0xf4   : >> { %v1161_v8 = vrot.slane %v1160_v6, 2  ;;  %v1172_v9 = vadd.f32 %v1171_v7, %v1170_v5 }
  0xf6   : >> { %v1162_v10 = vadd.f32 %v1161_v8, %v1160_v6  ;;  %v1173_v11 = vrot.slane %v1172_v9, 2 }
  0xf8   : >> { %v1163_v12 = vrot.slane %v1162_v10, 1  ;;  %v1174_v13 = vadd.f32 %v1173_v11, %v1172_v9 }
  0xfa   : >> { %v1164_v15 = vadd.f32 %v1163_v12, %v1162_v10  ;;  %v1175_v16 = vrot.slane %v1174_v13, 1 }
  0xfc   : >> { %v1165_v18 = vadd.f32 %v1164_v15, %v1157_v14  ;;  %v1176_v19 = vadd.f32 %v1175_v16, %v1174_v13  ;;  %325 = sbr.rel (!%p323_p6) target bundleno = 18 (0x12), region = 115 }
  0xfe   : >> { %1166 = vst [vmem:[%s1763_s4] sm:$0x1] %v1165_v18  ;;  %v1177_v20 = vadd.f32 %v1176_v19, %v1167_v17 }
 0x100   : >> { %1178 = vst [vmem:[%s1764_s5] sm:$0x1] %v1177_v20 }
 0x101 PF: > { %s16_s20 = sadd.s32 1, %s1569_s20   ;;  %s1765_s18 = smov %s1565_s19 }
 0x102   : > { %p13_p7 = scmp.ge.s32.totalorder %s16_s20, 4   ;;  %s1766_s19 = smov %s1768_s21 }
 0x104   :  { %15 = sbr.rel (!%p13_p7) target bundleno = 2 (0x2), region = 126 }

// kernel: double_conv.6
= control target key start
LH: loop header
LB: loop body
LE: loop exit
PB: predicated region body
PF: predicated region fallthrough
CT: control target
= control target key end

     0   :  { %s2156_s18 = smov 0   ;;  %s2158_s19 = smov 0   ;;  %s2678_s0 = inlined_call_operand.vmem [shape: f32[2,18,18,128], index: 0, kind: input, shape index: {}]   ;;  %s2679_s1 = inlined_call_operand.vmem [shape: f32[9,128,128], index: 1, kind: input, shape index: {}]   ;;  %s2680_s2 = inlined_call_operand.vmem [shape: f32[1,128], index: 2, kind: input, shape index: {}]   ;;  %s2681_s3 = inlined_call_operand.vmem [shape: f32[2,16,16,128], index: 3, kind: output, shape index: {0}]   ;;  %s2682_s4 = inlined_call_operand.vmem [shape: f32[1,128], index: 4, kind: output, shape index: {1}]   ;;  %s2683_s5 = inlined_call_operand.vmem [shape: f32[1,128], index: 5, kind: output, shape index: {2}]  }
   0x1   :  { %s2160_s20 = smov 0  }
   0x2 LB: > { %s31_s21 = sadd.s32 1, %s2115_s19  ;;  %p1429_p0 = scmp.ge.s32.totalorder %s2119_s20, 1  ;;  %s2119_s20 = sphi %s2160_s20, %s16_s20   ;;  %s2115_s19 = sphi %s2158_s19, %s2685_s19   ;;  %s2111_s18 = sphi %s2156_s18, %s2684_s18  }
   0x3   : > { %p33_p1 = scmp.ge.s32.totalorder %s31_s21, 2  ;;  %p232_p2 = scmp.lt.s32.totalorder %s2119_s20, 3 }
   0x5   : > { %s2687_s21 = smov (%p33_p1, %s31_s21), 0  ;;  %p233_p3 = pnand %p1429_p0, %p232_p2 }
   0x6   : > { %p281_p4 = scmp.lt.s32.totalorder (!%p233_p3), %s2111_s18, 1  ;;  %p313_p5 = scmp.eq.s32.totalorder (!%p233_p3), %s2111_s18, 0 }
   0x7   : > { %236 = sbr.rel (%p233_p3) target bundleno = 404 (0x194), region = 32 }
   0xc   : > { %s2689_s18 = smov (!%p281_p4, %s2111_s18), 1  ;;  %318 = sbr.rel (!%p313_p5) target bundleno = 17 (0x11), region = 36  ;;  %v2125_v0 = vmov (%p313_p5), 0.0  }
   0xd   : > { %s2059_s22 = smul.u32 432, %s2689_s18  ;;  %s1580_s23 = sshll.u32 %s2689_s18, 8  ;;  %319 = vst [vmem:[%s2682_s4] sm:$0x1] (%p313_p5), %v2125_v0  ;;  %320 = vst [vmem:[%s2683_s5] sm:$0x1] (%p313_p5), %v2125_v0 }
   0xe   : > { %s2177_s26 = scalar_lea.vmem %s2681_s3, %s1580_s23 }
   0xf   : > { %s2182_s29 = scalar_lea.vmem %s2678_s0, %s2059_s22 }
  0x11 PF: > { %s2190_s9 = smov 0  }
  0x12 LB: >> { %v1449_v1 = vld [vmem:[%s2679_s1 + $0xf8] sm:$0xff]  ;;  %v1448_v3 = vld [vmem:[%s2679_s1 + $0xf0] sm:$0xff]  ;;  %v1447_v5 = vld [vmem:[%s2679_s1 + $0xe8] sm:$0xff]  ;;  %s329_s28 = smul.u32 24, %s2123_s9  ;;  %s2123_s9 = sphi %s2190_s9, %s326_s9  }
  0x13   : >> { %v348_v2 = vld [vmem:[%s2679_s1 + $0x78] sm:$0xff]  ;;  %1744 = vmatprep.subr.mxu0 %v1449_v1  ;;  %v347_v4 = vld [vmem:[%s2679_s1 + $0x70] sm:$0xff]  ;;  %v346_v6 = vld [vmem:[%s2679_s1 + $0x68] sm:$0xff] }
  0x14   : >> { %1779 = vmatprep.subr.mxu1 %v348_v2  ;;  %1745 = vmatpush3.msra.mxu0 %v1449_v1  ;;  %v1446_v7 = vld [vmem:[%s2679_s1 + $0xe0] sm:$0xff]  ;;  %v1445_v9 = vld [vmem:[%s2679_s1 + $0xd8] sm:$0xff]  ;;  %v1444_v11 = vld [vmem:[%s2679_s1 + $0xd0] sm:$0xff]  ;;  %s2287_s14 = scalar_lea.vmem %s2182_s29, %s329_s28 }
  0x15   : >> { %1780 = vmatpush3.msra.mxu1 %v348_v2  ;;  %1746 = vmatprep.subr.mxu0 %v1448_v3  ;;  %v345_v8 = vld [vmem:[%s2679_s1 + $0x60] sm:$0xff]  ;;  %v344_v10 = vld [vmem:[%s2679_s1 + $0x58] sm:$0xff]  ;;  %v343_v12 = vld [vmem:[%s2679_s1 + $0x50] sm:$0xff] }
  0x16   : >> { %1781 = vmatprep.subr.mxu1 %v347_v4  ;;  %1747 = vmatpush3.msra.mxu0 %v1448_v3  ;;  %v1443_v13 = vld [vmem:[%s2679_s1 + $0xc8] sm:$0xff]  ;;  %v1442_v15 = vld [vmem:[%s2679_s1 + $0xc0] sm:$0xff]  ;;  %v1441_v17 = vld [vmem:[%s2679_s1 + $0xb8] sm:$0xff] }
  0x17   : >> { %1782 = vmatpush3.msra.mxu1 %v347_v4  ;;  %1748 = vmatprep.subr.mxu0 %v1447_v5  ;;  %v342_v14 = vld [vmem:[%s2679_s1 + $0x48] sm:$0xff]  ;;  %v341_v16 = vld [vmem:[%s2679_s1 + $0x40] sm:$0xff]  ;;  %v340_v18 = vld [vmem:[%s2679_s1 + $0x38] sm:$0xff] }
  0x18   : >> { %1783 = vmatprep.subr.mxu1 %v346_v6  ;;  %1749 = vmatpush3.msra.mxu0 %v1447_v5  ;;  %v1440_v19 = vld [vmem:[%s2679_s1 + $0xb0] sm:$0xff]  ;;  %v1439_v21 = vld [vmem:[%s2679_s1 + $0xa8] sm:$0xff]  ;;  %v1438_v23 = vld [vmem:[%s2679_s1 + $0xa0] sm:$0xff] }
  0x19   : >> { %1784 = vmatpush3.msra.mxu1 %v346_v6  ;;  %1750 = vmatprep.subr.mxu0 %v1446_v7  ;;  %v339_v20 = vld [vmem:[%s2679_s1 + $0x30] sm:$0xff]  ;;  %v338_v22 = vld [vmem:[%s2679_s1 + $0x28] sm:$0xff]  ;;  %v337_v24 = vld [vmem:[%s2679_s1 + $0x20] sm:$0xff] }
  0x1a   : >> { %1785 = vmatprep.subr.mxu1 %v345_v8  ;;  %1751 = vmatpush3.msra.mxu0 %v1446_v7  ;;  %v1437_v25 = vld [vmem:[%s2679_s1 + $0x98] sm:$0xff]  ;;  %v1436_v27 = vld [vmem:[%s2679_s1 + $0x90] sm:$0xff]  ;;  %v1435_v29 = vld [vmem:[%s2679_s1 + $0x88] sm:$0xff] }
  0x1b   : >> { %1786 = vmatpush3.msra.mxu1 %v345_v8  ;;  %1752 = vmatprep.subr.mxu0 %v1445_v9  ;;  %v336_v26 = vld [vmem:[%s2679_s1 + $0x18] sm:$0xff]  ;;  %v335_v28 = vld [vmem:[%s2679_s1 + $0x10] sm:$0xff]  ;;  %v334_v30 = vld [vmem:[%s2679_s1 + $0x8] sm:$0xff] }
  0x1c   : >> { %1787 = vmatprep.subr.mxu1 %v344_v10  ;;  %1753 = vmatpush3.msra.mxu0 %v1445_v9  ;;  %v1434_v31 = vld [vmem:[%s2679_s1 + $0x80] sm:$0xff]  ;;  %v350_v35 = vld [vmem:[%s2287_s14 + $0x9] sm:$0xff]  ;;  %v1465_v37 = vld [vmem:[%s2679_s1 + $0x178] sm:$0xff] }
  0x1d   : >> { %1788 = vmatpush3.msra.mxu1 %v344_v10  ;;  %1754 = vmatprep.subr.mxu0 %v1444_v11  ;;  %v333_v32 = vld [vmem:[%s2679_s1] sm:$0xff]  ;;  %v332_v36 = vld [vmem:[%s2287_s14 + $0x8] sm:$0xff]  ;;  %v1483_v38 = vld [vmem:[%s2679_s1 + $0x1f8] sm:$0xff] }
  0x1e   : >> { %1789 = vmatprep.subr.mxu1 %v343_v12  ;;  %1755 = vmatpush3.msra.mxu0 %v1444_v11  ;;  %v349_v33 = vld [vmem:[%s2287_s14 + $0x1] sm:$0xff]  ;;  %v1464_v39 = vld [vmem:[%s2679_s1 + $0x170] sm:$0xff]  ;;  %v1461_v45 = vld [vmem:[%s2679_s1 + $0x158] sm:$0xff] }
  0x1f   : >> { %1790 = vmatpush3.msra.mxu1 %v343_v12  ;;  %1756 = vmatprep.subr.mxu0 %v1443_v13  ;;  %v331_v34 = vld [vmem:[%s2287_s14] sm:$0xff]  ;;  %v1482_v40 = vld [vmem:[%s2679_s1 + $0x1f0] sm:$0xff]  ;;  %v1463_v41 = vld [vmem:[%s2679_s1 + $0x168] sm:$0xff] }
  0x20   : >> { %1791 = vmatprep.subr.mxu1 %v342_v14  ;;  %1757 = vmatpush3.msra.mxu0 %v1443_v13  ;;  %v1481_v42 = vld [vmem:[%s2679_s1 + $0x1e8] sm:$0xff]  ;;  %v1462_v43 = vld [vmem:[%s2679_s1 + $0x160] sm:$0xff]  ;;  %v1479_v46 = vld [vmem:[%s2679_s1 + $0x1d8] sm:$0xff] }
  0x21   : >> { %1792 = vmatpush3.msra.mxu1 %v342_v14  ;;  %1758 = vmatprep.subr.mxu0 %v1442_v15  ;;  %v1480_v44 = vld [vmem:[%s2679_s1 + $0x1e0] sm:$0xff]  ;;  %v1460_v47 = vld [vmem:[%s2679_s1 + $0x150] sm:$0xff]  ;;  %v1459_v49 = vld [vmem:[%s2679_s1 + $0x148] sm:$0xff] }
  0x22   : >> { %1793 = vmatprep.subr.mxu1 %v341_v16  ;;  %1759 = vmatpush3.msra.mxu0 %v1442_v15  ;;  %v1478_v48 = vld [vmem:[%s2679_s1 + $0x1d0] sm:$0xff]  ;;  %v1477_v50 = vld [vmem:[%s2679_s1 + $0x1c8] sm:$0xff]  ;;  %v1458_v51 = vld [vmem:[%s2679_s1 + $0x140] sm:$0xff] }
  0x23   : >> { %1794 = vmatpush3.msra.mxu1 %v341_v16  ;;  %1760 = vmatprep.subr.mxu0 %v1441_v17  ;;  %v1476_v52 = vld [vmem:[%s2679_s1 + $0x1c0] sm:$0xff]  ;;  %v1457_v53 = vld [vmem:[%s2679_s1 + $0x138] sm:$0xff]  ;;  %v1456_v55 = vld [vmem:[%s2679_s1 + $0x130] sm:$0xff] }
  0x24   : >> { %1795 = vmatprep.subr.mxu1 %v340_v18  ;;  %1761 = vmatpush3.msra.mxu0 %v1441_v17  ;;  %v1475_v54 = vld [vmem:[%s2679_s1 + $0x1b8] sm:$0xff]  ;;  %v1474_v56 = vld [vmem:[%s2679_s1 + $0x1b0] sm:$0xff]  ;;  %v1455_v57 = vld [vmem:[%s2679_s1 + $0x128] sm:$0xff] }
  0x25   : >> { %1796 = vmatpush3.msra.mxu1 %v340_v18  ;;  %1762 = vmatprep.subr.mxu0 %v1440_v19  ;;  %v1473_v58 = vld [vmem:[%s2679_s1 + $0x1a8] sm:$0xff]  ;;  %v1454_v59 = vld [vmem:[%s2679_s1 + $0x120] sm:$0xff]  ;;  %v1453_v61 = vld [vmem:[%s2679_s1 + $0x118] sm:$0xff] }
  0x26   : >> { %1797 = vmatprep.subr.mxu1 %v339_v20  ;;  %1763 = vmatpush3.msra.mxu0 %v1440_v19  ;;  %v1472_v60 = vld [vmem:[%s2679_s1 + $0x1a0] sm:$0xff]  ;;  %v1471_v62 = vld [vmem:[%s2679_s1 + $0x198] sm:$0xff]  ;;  %v1452_v63 = vld [vmem:[%s2679_s1 + $0x110] sm:$0xff] }
  0x27   : >> { %1798 = vmatpush3.msra.mxu1 %v339_v20  ;;  %1764 = vmatprep.subr.mxu0 %v1439_v21  ;;  %v1470_v0 = vld [vmem:[%s2679_s1 + $0x190] sm:$0xff]  ;;  %v1451_v1 = vld [vmem:[%s2679_s1 + $0x108] sm:$0xff]  ;;  %v1450_v4 = vld [vmem:[%s2679_s1 + $0x100] sm:$0xff] }
  0x28   : >> { %1799 = vmatprep.subr.mxu1 %v338_v22  ;;  %1765 = vmatpush3.msra.mxu0 %v1439_v21  ;;  %v1469_v2 = vld [vmem:[%s2679_s1 + $0x188] sm:$0xff]  ;;  %v1468_v5 = vld [vmem:[%s2679_s1 + $0x180] sm:$0xff]  ;;  %v1501_v7 = vld [vmem:[%s2679_s1 + $0x278] sm:$0xff] }
  0x29   : >> { %1800 = vmatpush3.msra.mxu1 %v338_v22  ;;  %1766 = vmatprep.subr.mxu0 %v1438_v23  ;;  %v518_v3 = vld [vmem:[%s2287_s14 + $0x2] sm:$0xff]  ;;  %v519_v6 = vld [vmem:[%s2287_s14 + $0xa] sm:$0xff]  ;;  %v1466_v8 = vld [vmem:[%s2287_s14 + $0x18] sm:$0xff] }
  0x2a   : >> { %1801 = vmatprep.subr.mxu1 %v337_v24  ;;  %1767 = vmatpush3.msra.mxu0 %v1438_v23  ;;  %v1467_v9 = vld [vmem:[%s2287_s14 + $0x20] sm:$0xff]  ;;  %v1500_v10 = vld [vmem:[%s2679_s1 + $0x270] sm:$0xff]  ;;  %v1519_v11 = vld [vmem:[%s2679_s1 + $0x2f8] sm:$0xff] }
  0x2b   : >> { %1802 = vmatpush3.msra.mxu1 %v337_v24  ;;  %1768 = vmatprep.subr.mxu0 %v1437_v25  ;;  %v1499_v12 = vld [vmem:[%s2679_s1 + $0x268] sm:$0xff]  ;;  %v1518_v13 = vld [vmem:[%s2679_s1 + $0x2f0] sm:$0xff]  ;;  %v1498_v14 = vld [vmem:[%s2679_s1 + $0x260] sm:$0xff] }
  0x2c   : >> { %1803 = vmatprep.subr.mxu1 %v336_v26  ;;  %1769 = vmatpush3.msra.mxu0 %v1437_v25  ;;  %v1517_v15 = vld [vmem:[%s2679_s1 + $0x2e8] sm:$0xff]  ;;  %v1497_v16 = vld [vmem:[%s2679_s1 + $0x258] sm:$0xff]  ;;  %v1516_v17 = vld [vmem:[%s2679_s1 + $0x2e0] sm:$0xff] }
  0x2d   : >> { %1804 = vmatpush3.msra.mxu1 %v336_v26  ;;  %1770 = vmatprep.subr.mxu0 %v1436_v27  ;;  %v1496_v18 = vld [vmem:[%s2679_s1 + $0x250] sm:$0xff]  ;;  %v1515_v19 = vld [vmem:[%s2679_s1 + $0x2d8] sm:$0xff]  ;;  %v1495_v20 = vld [vmem:[%s2679_s1 + $0x248] sm:$0xff] }
  0x2e   : >> { %1805 = vmatprep.subr.mxu1 %v335_v28  ;;  %1771 = vmatpush3.msra.mxu0 %v1436_v27  ;;  %v1514_v21 = vld [vmem:[%s2679_s1 + $0x2d0] sm:$0xff]  ;;  %v1494_v22 = vld [vmem:[%s2679_s1 + $0x240] sm:$0xff]  ;;  %v1513_v23 = vld [vmem:[%s2679_s1 + $0x2c8] sm:$0xff] }
  0x2f   : >> { %1806 = vmatpush3.msra.mxu1 %v335_v28  ;;  %1772 = vmatprep.subr.mxu0 %v1435_v29  ;;  %v1493_v24 = vld [vmem:[%s2679_s1 + $0x238] sm:$0xff]  ;;  %v1512_v25 = vld [vmem:[%s2679_s1 + $0x2c0] sm:$0xff]  ;;  %v1492_v26 = vld [vmem:[%s2679_s1 + $0x230] sm:$0xff] }
  0x30   : >> { %1807 = vmatprep.subr.mxu1 %v334_v30  ;;  %1773 = vmatpush3.msra.mxu0 %v1435_v29  ;;  %v1511_v27 = vld [vmem:[%s2679_s1 + $0x2b8] sm:$0xff]  ;;  %v1491_v28 = vld [vmem:[%s2679_s1 + $0x228] sm:$0xff]  ;;  %v1510_v29 = vld [vmem:[%s2679_s1 + $0x2b0] sm:$0xff] }
  0x31   : >> { %1808 = vmatpush3.msra.mxu1 %v334_v30  ;;  %1774 = vmatprep.subr.mxu0 %v1434_v31  ;;  %v1490_v30 = vld [vmem:[%s2679_s1 + $0x220] sm:$0xff] }
  0x32   : >> { %1809 = vmatprep.subr.mxu1 %v333_v32  ;;  %1775 = vmatpush3.msra.mxu0 %v1434_v31  ;;  %v1509_v31 = vld [vmem:[%s2679_s1 + $0x2a8] sm:$0xff] }
  0x33   : >> { %1776 = vmatprep.mubr.f32.mxu0 %v349_v33  ;;  %1810 = vmatpush3.msra.mxu1 %v333_v32  ;;  %v1489_v32 = vld [vmem:[%s2679_s1 + $0x218] sm:$0xff]  ;;  %v1508_v33 = vld [vmem:[%s2679_s1 + $0x2a0] sm:$0xff] }
  0x34   : >> { %1811 = vmatprep.mubr.f32.mxu1 %v331_v34  ;;  %1777 = vmatmul.mubr.f32.vlgmr.msra.gmra.mxu0 %v350_v35  ;;  %v1488_v34 = vld [vmem:[%s2679_s1 + $0x210] sm:$0xff]  ;;  %v1507_v35 = vld [vmem:[%s2679_s1 + $0x298] sm:$0xff] }
  0x35   : >> { %1812 = vmatmul.mubr.f32.vlgmr.msra.gmra.mxu1 %v332_v36  ;;  %1814 = vmatprep.subr.mxu0 %v1465_v37  ;;  %v1487_v36 = vld [vmem:[%s2679_s1 + $0x208] sm:$0xff] }
  0x36   : >> { %1849 = vmatprep.subr.mxu1 %v1483_v38  ;;  %1815 = vmatpush3.msra.mxu0 %v1465_v37  ;;  %v1506_v37 = vld [vmem:[%s2679_s1 + $0x290] sm:$0xff] }
  0x37   : >> { %1850 = vmatpush3.msra.mxu1 %v1483_v38  ;;  %1816 = vmatprep.subr.mxu0 %v1464_v39  ;;  %v1486_v38 = vld [vmem:[%s2679_s1 + $0x200] sm:$0xff] }
  0x38   : >> { %1851 = vmatprep.subr.mxu1 %v1482_v40  ;;  %1817 = vmatpush3.msra.mxu0 %v1464_v39  ;;  %v1505_v39 = vld [vmem:[%s2679_s1 + $0x288] sm:$0xff] }
  0x39   : >> { %1852 = vmatpush3.msra.mxu1 %v1482_v40  ;;  %1818 = vmatprep.subr.mxu0 %v1463_v41  ;;  %v1484_v40 = vld [vmem:[%s2287_s14 + $0x19] sm:$0xff] }
  0x3a   : >> { %1853 = vmatprep.subr.mxu1 %v1481_v42  ;;  %1819 = vmatpush3.msra.mxu0 %v1463_v41  ;;  %v1485_v41 = vld [vmem:[%s2287_s14 + $0x21] sm:$0xff] }
  0x3b   : >> { %1854 = vmatpush3.msra.mxu1 %v1481_v42  ;;  %1820 = vmatprep.subr.mxu0 %v1462_v43  ;;  %v1504_v42 = vld [vmem:[%s2679_s1 + $0x280] sm:$0xff] }
  0x3c   : >> { %1855 = vmatprep.subr.mxu1 %v1480_v44  ;;  %1821 = vmatpush3.msra.mxu0 %v1462_v43  ;;  %v1537_v43 = vld [vmem:[%s2679_s1 + $0x378] sm:$0xff] }
  0x3d   : >> { %1856 = vmatpush3.msra.mxu1 %v1480_v44  ;;  %1822 = vmatprep.subr.mxu0 %v1461_v45  ;;  %v1502_v44 = vld [vmem:[%s2287_s14 + $0x1a] sm:$0xff] }
  0x3e   : >> { %1857 = vmatprep.subr.mxu1 %v1479_v46  ;;  %1823 = vmatpush3.msra.mxu0 %v1461_v45  ;;  %v1503_v45 = vld [vmem:[%s2287_s14 + $0x22] sm:$0xff] }
  0x3f   : >> { %1858 = vmatpush3.msra.mxu1 %v1479_v46  ;;  %1824 = vmatprep.subr.mxu0 %v1460_v47  ;;  %v1536_v46 = vld [vmem:[%s2679_s1 + $0x370] sm:$0xff] }
  0x40   : >> { %1859 = vmatprep.subr.mxu1 %v1478_v48  ;;  %1825 = vmatpush3.msra.mxu0 %v1460_v47  ;;  %v1555_v47 = vld [vmem:[%s2679_s1 + $0x3f8] sm:$0xff] }
  0x41   : >> { %1860 = vmatpush3.msra.mxu1 %v1478_v48  ;;  %1826 = vmatprep.subr.mxu0 %v1459_v49  ;;  %v1535_v48 = vld [vmem:[%s2679_s1 + $0x368] sm:$0xff] }
  0x42   : >> { %1861 = vmatprep.subr.mxu1 %v1477_v50  ;;  %1827 = vmatpush3.msra.mxu0 %v1459_v49  ;;  %v1554_v49 = vld [vmem:[%s2679_s1 + $0x3f0] sm:$0xff] }
  0x43   : >> { %1862 = vmatpush3.msra.mxu1 %v1477_v50  ;;  %1828 = vmatprep.subr.mxu0 %v1458_v51  ;;  %v1534_v50 = vld [vmem:[%s2679_s1 + $0x360] sm:$0xff] }
  0x44   : >> { %1863 = vmatprep.subr.mxu1 %v1476_v52  ;;  %1829 = vmatpush3.msra.mxu0 %v1458_v51  ;;  %v1553_v51 = vld [vmem:[%s2679_s1 + $0x3e8] sm:$0xff] }
  0x45   : >> { %1864 = vmatpush3.msra.mxu1 %v1476_v52  ;;  %1830 = vmatprep.subr.mxu0 %v1457_v53  ;;  %v1533_v52 = vld [vmem:[%s2679_s1 + $0x358] sm:$0xff] }
  0x46   : >> { %1865 = vmatprep.subr.mxu1 %v1475_v54  ;;  %1831 = vmatpush3.msra.mxu0 %v1457_v53  ;;  %v1552_v53 = vld [vmem:[%s2679_s1 + $0x3e0] sm:$0xff] }
  0x47   : >> { %1866 = vmatpush3.msra.mxu1 %v1475_v54  ;;  %1832 = vmatprep.subr.mxu0 %v1456_v55  ;;  %v1532_v54 = vld [vmem:[%s2679_s1 + $0x350] sm:$0xff] }
  0x48   : >> { %1867 = vmatprep.subr.mxu1 %v1474_v56  ;;  %1833 = vmatpush3.msra.mxu0 %v1456_v55  ;;  %v1551_v55 = vld [vmem:[%s2679_s1 + $0x3d8] sm:$0xff] }
  0x49   : >> { %1868 = vmatpush3.msra.mxu1 %v1474_v56  ;;  %1834 = vmatprep.subr.mxu0 %v1455_v57  ;;  %v1531_v56 = vld [vmem:[%s2679_s1 + $0x348] sm:$0xff] }
  0x4a   : >> { %1869 = vmatprep.subr.mxu1 %v1473_v58  ;;  %1835 = vmatpush3.msra.mxu0 %v1455_v57  ;;  %v1550_v57 = vld [vmem:[%s2679_s1 + $0x3d0] sm:$0xff] }
  0x4b   : >> { %1870 = vmatpush3.msra.mxu1 %v1473_v58  ;;  %1836 = vmatprep.subr.mxu0 %v1454_v59  ;;  %v1530_v58 = vld [vmem:[%s2679_s1 + $0x340] sm:$0xff] }
  0x4c   : >> { %1871 = vmatprep.subr.mxu1 %v1472_v60  ;;  %1837 = vmatpush3.msra.mxu0 %v1454_v59  ;;  %v1549_v59 = vld [vmem:[%s2679_s1 + $0x3c8] sm:$0xff] }
  0x4d   : >> { %1872 = vmatpush3.msra.mxu1 %v1472_v60  ;;  %1838 = vmatprep.subr.mxu0 %v1453_v61  ;;  %v1529_v60 = vld [vmem:[%s2679_s1 + $0x338] sm:$0xff] }
  0x4e   : >> { %1873 = vmatprep.subr.mxu1 %v1471_v62  ;;  %1839 = vmatpush3.msra.mxu0 %v1453_v61  ;;  %v1548_v61 = vld [vmem:[%s2679_s1 + $0x3c0] sm:$0xff] }
  0x4f   : >> { %1874 = vmatpush3.msra.mxu1 %v1471_v62  ;;  %1840 = vmatprep.subr.mxu0 %v1452_v63  ;;  %v1528_v62 = vld [vmem:[%s2679_s1 + $0x330] sm:$0xff] }
  0x50   : >> { %1875 = vmatprep.subr.mxu1 %v1470_v0  ;;  %1841 = vmatpush3.msra.mxu0 %v1452_v63  ;;  %v1547_v63 = vld [vmem:[%s2679_s1 + $0x3b8] sm:$0xff] }
  0x51   : >> { %1876 = vmatpush3.msra.mxu1 %v1470_v0  ;;  %1842 = vmatprep.subr.mxu0 %v1451_v1  ;;  %v1527_v0 = vld [vmem:[%s2679_s1 + $0x328] sm:$0xff] }
  0x52   : >> { %1877 = vmatprep.subr.mxu1 %v1469_v2  ;;  %1843 = vmatpush3.msra.mxu0 %v1451_v1  ;;  %v1546_v1 = vld [vmem:[%s2679_s1 + $0x3b0] sm:$0xff] }
  0x53   : >> { %1846 = vmatprep.mubr.f32.mxu0 %v518_v3  ;;  %1844 = vmatprep.subr.mxu0 %v1450_v4  ;;  %v1545_v3 = vld [vmem:[%s2679_s1 + $0x3a8] sm:$0xff] }
  0x54   : >> { %1878 = vmatpush3.msra.mxu1 %v1469_v2  ;;  %1845 = vmatpush3.msra.mxu0 %v1450_v4  ;;  %v1526_v2 = vld [vmem:[%s2679_s1 + $0x320] sm:$0xff]  ;;  %v1525_v4 = vld [vmem:[%s2679_s1 + $0x318] sm:$0xff] }
  0x55   : >> { %1879 = vmatprep.subr.mxu1 %v1468_v5  ;;  %1847 = vmatmul.mubr.f32.vlgmr.msra.gmra.mxu0 %v519_v6  ;;  %v1524_v6 = vld [vmem:[%s2679_s1 + $0x310] sm:$0xff] }
  0x56   : >> { %1884 = vmatprep.subr.mxu0 %v1501_v7  ;;  %1880 = vmatpush3.msra.mxu1 %v1468_v5  ;;  %v1544_v5 = vld [vmem:[%s2679_s1 + $0x3a0] sm:$0xff] }
  0x57   : >> { %1881 = vmatprep.mubr.f32.mxu1 %v1466_v8  ;;  %1885 = vmatpush3.msra.mxu0 %v1501_v7  ;;  %v1543_v7 = vld [vmem:[%s2679_s1 + $0x398] sm:$0xff]  ;;  %v1523_v8 = vld [vmem:[%s2679_s1 + $0x308] sm:$0xff] }
  0x58   : >> { %1882 = vmatmul.mubr.f32.vlgmr.msra.gmra.mxu1 %v1467_v9  ;;  %1886 = vmatprep.subr.mxu0 %v1500_v10  ;;  %v1542_v9 = vld [vmem:[%s2679_s1 + $0x390] sm:$0xff] }
  0x59   : >> { %1919 = vmatprep.subr.mxu1 %v1519_v11  ;;  %1887 = vmatpush3.msra.mxu0 %v1500_v10  ;;  %v1522_v10 = vld [vmem:[%s2679_s1 + $0x300] sm:$0xff] }
  0x5a   : >> { %1920 = vmatpush3.msra.mxu1 %v1519_v11  ;;  %1888 = vmatprep.subr.mxu0 %v1499_v12  ;;  %v1541_v11 = vld [vmem:[%s2679_s1 + $0x388] sm:$0xff] }
  0x5b   : >> { %1921 = vmatprep.subr.mxu1 %v1518_v13  ;;  %1889 = vmatpush3.msra.mxu0 %v1499_v12  ;;  %v1520_v12 = vld [vmem:[%s2287_s14 + $0x30] sm:$0xff] }
  0x5c   : >> { %1922 = vmatpush3.msra.mxu1 %v1518_v13  ;;  %1890 = vmatprep.subr.mxu0 %v1498_v14  ;;  %v1521_v13 = vld [vmem:[%s2287_s14 + $0x38] sm:$0xff] }
  0x5d   : >> { %1923 = vmatprep.subr.mxu1 %v1517_v15  ;;  %1891 = vmatpush3.msra.mxu0 %v1498_v14  ;;  %v1540_v14 = vld [vmem:[%s2679_s1 + $0x380] sm:$0xff] }
  0x5e   : >> { %1924 = vmatpush3.msra.mxu1 %v1517_v15  ;;  %1892 = vmatprep.subr.mxu0 %v1497_v16  ;;  %v1573_v15 = vld [vmem:[%s2679_s1 + $0x478] sm:$0xff] }
  0x5f   : >> { %1925 = vmatprep.subr.mxu1 %v1516_v17  ;;  %1893 = vmatpush3.msra.mxu0 %v1497_v16  ;;  %v1538_v16 = vld [vmem:[%s2287_s14 + $0x31] sm:$0xff] }
  0x60   : >> { %1926 = vmatpush3.msra.mxu1 %v1516_v17  ;;  %1894 = vmatprep.subr.mxu0 %v1496_v18  ;;  %v1539_v17 = vld [vmem:[%s2287_s14 + $0x39] sm:$0xff] }
  0x61   : >> { %1927 = vmatprep.subr.mxu1 %v1515_v19  ;;  %1895 = vmatpush3.msra.mxu0 %v1496_v18  ;;  %v1572_v18 = vld [vmem:[%s2679_s1 + $0x470] sm:$0xff] }
  0x62   : >> { %1928 = vmatpush3.msra.mxu1 %v1515_v19  ;;  %1896 = vmatprep.subr.mxu0 %v1495_v20  ;;  %v1556_v19 = vld [vmem:[%s2287_s14 + $0x32] sm:$0xff] }
  0x63   : >> { %1929 = vmatprep.subr.mxu1 %v1514_v21  ;;  %1897 = vmatpush3.msra.mxu0 %v1495_v20  ;;  %v1571_v20 = vld [vmem:[%s2679_s1 + $0x468] sm:$0xff] }
  0x64   : >> { %1930 = vmatpush3.msra.mxu1 %v1514_v21  ;;  %1898 = vmatprep.subr.mxu0 %v1494_v22  ;;  %v1570_v21 = vld [vmem:[%s2679_s1 + $0x460] sm:$0xff] }
  0x65   : >> { %1931 = vmatprep.subr.mxu1 %v1513_v23  ;;  %1899 = vmatpush3.msra.mxu0 %v1494_v22  ;;  %v1569_v22 = vld [vmem:[%s2679_s1 + $0x458] sm:$0xff] }
  0x66   : >> { %1932 = vmatpush3.msra.mxu1 %v1513_v23  ;;  %1900 = vmatprep.subr.mxu0 %v1493_v24  ;;  %v1568_v23 = vld [vmem:[%s2679_s1 + $0x450] sm:$0xff] }
  0x67   : >> { %1933 = vmatprep.subr.mxu1 %v1512_v25  ;;  %1901 = vmatpush3.msra.mxu0 %v1493_v24  ;;  %v1567_v24 = vld [vmem:[%s2679_s1 + $0x448] sm:$0xff] }
  0x68   : >> { %1934 = vmatpush3.msra.mxu1 %v1512_v25  ;;  %1902 = vmatprep.subr.mxu0 %v1492_v26  ;;  %v1566_v25 = vld [vmem:[%s2679_s1 + $0x440] sm:$0xff] }
  0x69   : >> { %1935 = vmatprep.subr.mxu1 %v1511_v27  ;;  %1903 = vmatpush3.msra.mxu0 %v1492_v26  ;;  %v1565_v26 = vld [vmem:[%s2679_s1 + $0x438] sm:$0xff] }
  0x6a   : >> { %1936 = vmatpush3.msra.mxu1 %v1511_v27  ;;  %1904 = vmatprep.subr.mxu0 %v1491_v28  ;;  %v1564_v27 = vld [vmem:[%s2679_s1 + $0x430] sm:$0xff] }
  0x6b   : >> { %1937 = vmatprep.subr.mxu1 %v1510_v29  ;;  %1905 = vmatpush3.msra.mxu0 %v1491_v28  ;;  %v1563_v28 = vld [vmem:[%s2679_s1 + $0x428] sm:$0xff] }
  0x6c   : >> { %1938 = vmatpush3.msra.mxu1 %v1510_v29  ;;  %1906 = vmatprep.subr.mxu0 %v1490_v30  ;;  %v1562_v29 = vld [vmem:[%s2679_s1 + $0x420] sm:$0xff] }
  0x6d   : >> { %1939 = vmatprep.subr.mxu1 %v1509_v31  ;;  %1907 = vmatpush3.msra.mxu0 %v1490_v30  ;;  %v1561_v30 = vld [vmem:[%s2679_s1 + $0x418] sm:$0xff] }
  0x6e   : >> { %1940 = vmatpush3.msra.mxu1 %v1509_v31  ;;  %1908 = vmatprep.subr.mxu0 %v1489_v32  ;;  %v1560_v31 = vld [vmem:[%s2679_s1 + $0x410] sm:$0xff] }
  0x6f   : >> { %1941 = vmatprep.subr.mxu1 %v1508_v33  ;;  %1909 = vmatpush3.msra.mxu0 %v1489_v32  ;;  %v1559_v32 = vld [vmem:[%s2679_s1 + $0x408] sm:$0xff] }
  0x70   : >> { %1942 = vmatpush3.msra.mxu1 %v1508_v33  ;;  %1910 = vmatprep.subr.mxu0 %v1488_v34  ;;  %v1558_v33 = vld [vmem:[%s2679_s1 + $0x400] sm:$0xff] }
  0x71   : >> { %1943 = vmatprep.subr.mxu1 %v1507_v35  ;;  %1911 = vmatpush3.msra.mxu0 %v1488_v34  ;;  %v1557_v34 = vld [vmem:[%s2287_s14 + $0x3a] sm:$0xff]  ;;  %s1575_s14 = sshll.u32 %s2123_s9, 4  ;;  %s326_s9 = sadd.s32 1, %s2123_s9  }
  0x72   : >> { %1944 = vmatpush3.msra.mxu1 %v1507_v35  ;;  %1912 = vmatprep.subr.mxu0 %v1487_v36  ;;  %s1206_s10 = scalar_lea.vmem %s2177_s26, %s1575_s14  ;;  %p323_p6 = scmp.ge.s32.totalorder %s326_s9, 16  }
  0x73   : >> { %1945 = vmatprep.subr.mxu1 %v1506_v37  ;;  %1913 = vmatpush3.msra.mxu0 %v1487_v36 }
  0x74   : >> { %1946 = vmatpush3.msra.mxu1 %v1506_v37  ;;  %1914 = vmatprep.subr.mxu0 %v1486_v38 }
  0x75   : >> { %1947 = vmatprep.subr.mxu1 %v1505_v39  ;;  %1915 = vmatpush3.msra.mxu0 %v1486_v38 }
  0x76   : >> { %1916 = vmatprep.mubr.f32.mxu0 %v1484_v40  ;;  %1948 = vmatpush3.msra.mxu1 %v1505_v39 }
  0x77   : >> { %1917 = vmatmul.mubr.f32.vlgmr.msra.gmra.mxu0 %v1485_v41  ;;  %1949 = vmatprep.subr.mxu1 %v1504_v42 }
  0x78   : >> { %1954 = vmatprep.subr.mxu0 %v1537_v43  ;;  %1950 = vmatpush3.msra.mxu1 %v1504_v42 }
  0x79   : >> { %1951 = vmatprep.mubr.f32.mxu1 %v1502_v44  ;;  %1955 = vmatpush3.msra.mxu0 %v1537_v43 }
  0x7a   : >> { %1952 = vmatmul.mubr.f32.vlgmr.msra.gmra.mxu1 %v1503_v45  ;;  %1956 = vmatprep.subr.mxu0 %v1536_v46 }
  0x7b   : >> { %1989 = vmatprep.subr.mxu1 %v1555_v47  ;;  %1957 = vmatpush3.msra.mxu0 %v1536_v46 }
  0x7c   : >> { %1990 = vmatpush3.msra.mxu1 %v1555_v47  ;;  %1958 = vmatprep.subr.mxu0 %v1535_v48 }
  0x7d   : >> { %1991 = vmatprep.subr.mxu1 %v1554_v49  ;;  %1959 = vmatpush3.msra.mxu0 %v1535_v48 }
  0x7e   : >> { %1992 = vmatpush3.msra.mxu1 %v1554_v49  ;;  %1960 = vmatprep.subr.mxu0 %v1534_v50 }
  0x7f   : >> { %1993 = vmatprep.subr.mxu1 %v1553_v51  ;;  %1961 = vmatpush3.msra.mxu0 %v1534_v50 }
  0x80   : >> { %1994 = vmatpush3.msra.mxu1 %v1553_v51  ;;  %1962 = vmatprep.subr.mxu0 %v1533_v52 }
  0x81   : >> { %1995 = vmatprep.subr.mxu1 %v1552_v53  ;;  %1963 = vmatpush3.msra.mxu0 %v1533_v52 }
  0x82   : >> { %1996 = vmatpush3.msra.mxu1 %v1552_v53  ;;  %1964 = vmatprep.subr.mxu0 %v1532_v54 }
  0x83   : >> { %1997 = vmatprep.subr.mxu1 %v1551_v55  ;;  %1965 = vmatpush3.msra.mxu0 %v1532_v54 }
  0x84   : >> { %1998 = vmatpush3.msra.mxu1 %v1551_v55  ;;  %1966 = vmatprep.subr.mxu0 %v1531_v56 }
  0x85   : >> { %1999 = vmatprep.subr.mxu1 %v1550_v57  ;;  %1967 = vmatpush3.msra.mxu0 %v1531_v56 }
  0x86   : >> { %2000 = vmatpush3.msra.mxu1 %v1550_v57  ;;  %1968 = vmatprep.subr.mxu0 %v1530_v58 }
  0x87   : >> { %2001 = vmatprep.subr.mxu1 %v1549_v59  ;;  %1969 = vmatpush3.msra.mxu0 %v1530_v58 }
  0x88   : >> { %2002 = vmatpush3.msra.mxu1 %v1549_v59  ;;  %1970 = vmatprep.subr.mxu0 %v1529_v60 }
  0x89   : >> { %2003 = vmatprep.subr.mxu1 %v1548_v61  ;;  %1971 = vmatpush3.msra.mxu0 %v1529_v60 }
  0x8a   : >> { %2004 = vmatpush3.msra.mxu1 %v1548_v61  ;;  %1972 = vmatprep.subr.mxu0 %v1528_v62 }
  0x8b   : >> { %2005 = vmatprep.subr.mxu1 %v1547_v63  ;;  %1973 = vmatpush3.msra.mxu0 %v1528_v62 }
  0x8c   : >> { %2006 = vmatpush3.msra.mxu1 %v1547_v63  ;;  %1974 = vmatprep.subr.mxu0 %v1527_v0 }
  0x8d   : >> { %2007 = vmatprep.subr.mxu1 %v1546_v1  ;;  %1975 = vmatpush3.msra.mxu0 %v1527_v0 }
  0x8e   : >> { %2008 = vmatpush3.msra.mxu1 %v1546_v1  ;;  %1976 = vmatprep.subr.mxu0 %v1526_v2  ;;  %v1574_v1 = vld [vmem:[%s2680_s2] ss:$0 sm:$0xff] }
  0x8f   : >> { %2009 = vmatprep.subr.mxu1 %v1545_v3  ;;  %1977 = vmatpush3.msra.mxu0 %v1526_v2 }
  0x90   : >> { %2010 = vmatpush3.msra.mxu1 %v1545_v3  ;;  %1978 = vmatprep.subr.mxu0 %v1525_v4 }
  0x91   : >> { %2011 = vmatprep.subr.mxu1 %v1544_v5  ;;  %1979 = vmatpush3.msra.mxu0 %v1525_v4 }
  0x92   : >> { %2012 = vmatpush3.msra.mxu1 %v1544_v5  ;;  %1980 = vmatprep.subr.mxu0 %v1524_v6 }
  0x93   : >> { %2013 = vmatprep.subr.mxu1 %v1543_v7  ;;  %1981 = vmatpush3.msra.mxu0 %v1524_v6 }
  0x94   : >> { %2014 = vmatpush3.msra.mxu1 %v1543_v7  ;;  %1982 = vmatprep.subr.mxu0 %v1523_v8 }
  0x95   : >> { %2015 = vmatprep.subr.mxu1 %v1542_v9  ;;  %1983 = vmatpush3.msra.mxu0 %v1523_v8 }
  0x96   : >> { %2016 = vmatpush3.msra.mxu1 %v1542_v9  ;;  %1984 = vmatprep.subr.mxu0 %v1522_v10 }
  0x97   : >> { %2017 = vmatprep.subr.mxu1 %v1541_v11  ;;  %1985 = vmatpush3.msra.mxu0 %v1522_v10 }
  0x98   : >> { %1986 = vmatprep.mubr.f32.mxu0 %v1520_v12  ;;  %2018 = vmatpush3.msra.mxu1 %v1541_v11 }
  0x99   : >> { %1987 = vmatmul.mubr.f32.vlgmr.msra.gmra.mxu0 %v1521_v13  ;;  %2019 = vmatprep.subr.mxu1 %v1540_v14 }
  0x9a   : >> { %2024 = vmatprep.subr.mxu0 %v1573_v15  ;;  %2020 = vmatpush3.msra.mxu1 %v1540_v14 }
  0x9b   : >> { %2021 = vmatprep.mubr.f32.mxu1 %v1538_v16  ;;  %2025 = vmatpush3.msra.mxu0 %v1573_v15 }
  0x9c   : >> { %2022 = vmatmul.mubr.f32.vlgmr.msra.gmra.mxu1 %v1539_v17  ;;  %2026 = vmatprep.subr.mxu0 %v1572_v18 }
  0x9d   : >> { %2056 = vmatprep.mubr.f32.mxu0 %v1556_v19  ;;  %2027 = vmatpush3.msra.mxu0 %v1572_v18 }
  0x9e   : >> { %2028 = vmatprep.subr.mxu0 %v1571_v20 }
  0x9f   : >> { %2029 = vmatpush3.msra.mxu0 %v1571_v20 }
  0xa0   : >> { %2030 = vmatprep.subr.mxu0 %v1570_v21 }
  0xa1   : >> { %2031 = vmatpush3.msra.mxu0 %v1570_v21  ;;  %v1209_v21 = vld [vmem:[%s2682_s4] sm:$0x1] }
  0xa2   : >> { %2032 = vmatprep.subr.mxu0 %v1569_v22 }
  0xa3   : >> { %2033 = vmatpush3.msra.mxu0 %v1569_v22 }
  0xa4   : >> { %2034 = vmatprep.subr.mxu0 %v1568_v23 }
  0xa5   : >> { %2035 = vmatpush3.msra.mxu0 %v1568_v23 }
  0xa6   : >> { %2036 = vmatprep.subr.mxu0 %v1567_v24 }
  0xa7   : >> { %2037 = vmatpush3.msra.mxu0 %v1567_v24  ;;  %v1219_v24 = vld [vmem:[%s2683_s5] sm:$0x1] }
  0xa8   : >> { %2038 = vmatprep.subr.mxu0 %v1566_v25 }
  0xa9   : >> { %2039 = vmatpush3.msra.mxu0 %v1566_v25 }
  0xaa   : >> { %2040 = vmatprep.subr.mxu0 %v1565_v26 }
  0xab   : >> { %2041 = vmatpush3.msra.mxu0 %v1565_v26 }
  0xac   : >> { %2042 = vmatprep.subr.mxu0 %v1564_v27 }
  0xad   : >> { %2043 = vmatpush3.msra.mxu0 %v1564_v27 }
  0xae   : >> { %2044 = vmatprep.subr.mxu0 %v1563_v28 }
  0xaf   : >> { %2045 = vmatpush3.msra.mxu0 %v1563_v28 }
  0xb0   : >> { %2046 = vmatprep.subr.mxu0 %v1562_v29 }
  0xb1   : >> { %2047 = vmatpush3.msra.mxu0 %v1562_v29 }
  0xb2   : >> { %2048 = vmatprep.subr.mxu0 %v1561_v30 }
  0xb3   : >> { %2049 = vmatpush3.msra.mxu0 %v1561_v30 }
  0xb4   : >> { %2050 = vmatprep.subr.mxu0 %v1560_v31 }
  0xb5   : >> { %2051 = vmatpush3.msra.mxu0 %v1560_v31 }
  0xb6   : >> { %2052 = vmatprep.subr.mxu0 %v1559_v32 }
  0xb7   : >> { %2053 = vmatpush3.msra.mxu0 %v1559_v32 }
  0xb8   : >> { %2054 = vmatprep.subr.mxu0 %v1558_v33 }
  0xb9   : >> { %2055 = vmatpush3.msra.mxu0 %v1558_v33 }
  0xba   : >> { %2057 = vmatmul.mubr.f32.vlgmr.msra.gmra.mxu0 %v1557_v34 }
  0xf4   : >> { %v1778_v35 = vpop.f32.mrf.mxu0 }
  0xf5   : >> { %v1813_v36 = vpop.f32.mrf.mxu1 }
  0xf6   : >> { %v434_v37 = vpop.f32.mrf.mxu0  ;;  %v515_v40 = vadd.f32 %v1813_v36, %v1778_v35 }
  0xf7   : >> { %v509_v39 = vpop.f32.mrf.mxu1 }
  0xf8   : >> { %v510_v43 = vadd.f32 %v509_v39, %v434_v37 }
 0x115   : >> { %v1848_v38 = vpop.f32.mrf.mxu0 }
 0x116   : >> { %v613_v44 = vadd.f32 %v1848_v38, %v515_v40 }
 0x117   : >> { %v603_v41 = vpop.f32.mrf.mxu0 }
 0x118   : >> { %v1883_v42 = vpop.f32.mrf.mxu1  ;;  %v612_v46 = vadd.f32 %v603_v41, %v510_v43 }
 0x119   : >> { %v712_v48 = vadd.f32 %v1883_v42, %v613_v44 }
 0x11a   : >> { %v702_v47 = vpop.f32.mrf.mxu1 }
 0x11b   : >> { %v711_v51 = vadd.f32 %v702_v47, %v612_v46 }
 0x137   : >> { %v1918_v45 = vpop.f32.mrf.mxu0 }
 0x138   : >> { %v808_v52 = vadd.f32 %v1918_v45, %v712_v48 }
 0x139   : >> { %v798_v49 = vpop.f32.mrf.mxu0 }
 0x13a   : >> { %v1953_v50 = vpop.f32.mrf.mxu1  ;;  %v807_v54 = vadd.f32 %v798_v49, %v711_v51 }
 0x13b   : >> { %v904_v56 = vadd.f32 %v1953_v50, %v808_v52 }
 0x13c   : >> { %v894_v55 = vpop.f32.mrf.mxu1 }
 0x13d   : >> { %v903_v59 = vadd.f32 %v894_v55, %v807_v54 }
 0x159   : >> { %v1988_v53 = vpop.f32.mrf.mxu0 }
 0x15a   : >> { %v1003_v60 = vadd.f32 %v1988_v53, %v904_v56 }
 0x15b   : >> { %v993_v57 = vpop.f32.mrf.mxu0 }
 0x15c   : >> { %v2023_v58 = vpop.f32.mrf.mxu1  ;;  %v1002_v61 = vadd.f32 %v993_v57, %v903_v59 }
 0x15d   : >> { %v1099_v63 = vadd.f32 %v2023_v58, %v1003_v60 }
 0x15e   : >> { %v1089_v62 = vpop.f32.mrf.mxu1 }
 0x15f   : >> { %v1098_v2 = vadd.f32 %v1089_v62, %v1002_v61 }
 0x17a   : >> { %v2058_v0 = vpop.f32.mrf.mxu0 }
 0x17b   : >> { %v1195_v3 = vadd.f32 %v2058_v0, %v1099_v63 }
 0x17c   : >> { %v1185_v4 = vpop.f32.mrf.mxu0 }
 0x17d   : >> { %v1204_v5 = vadd.f32 %v1574_v1, %v1195_v3  ;;  %v1194_v6 = vadd.f32 %v1185_v4, %v1098_v2 }
 0x17f   : >> { %1208 = vst [vmem:[%s1206_s10 + $0x8] sm:$0xff] %v1204_v5  ;;  %v1203_v7 = vadd.f32 %v1574_v1, %v1194_v6  ;;  %v1221_v8 = vmul.f32 %v1204_v5, %v1204_v5 }
 0x181   : >> { %1207 = vst [vmem:[%s1206_s10] sm:$0xff] %v1203_v7  ;;  %v1210_v9 = vadd.f32 %v1204_v5, %v1203_v7  ;;  %v1220_v10 = vmul.f32 %v1203_v7, %v1203_v7 }
 0x183   : >> { %v1211_v11 = vrot.slane %v1210_v9, 4  ;;  %v1222_v12 = vadd.f32 %v1221_v8, %v1220_v10 }
 0x185   : >> { %v1212_v13 = vadd.f32 %v1211_v11, %v1210_v9  ;;  %v1223_v14 = vrot.slane %v1222_v12, 4 }
 0x187   : >> { %v1213_v15 = vrot.slane %v1212_v13, 2  ;;  %v1224_v16 = vadd.f32 %v1223_v14, %v1222_v12 }
 0x189   : >> { %v1214_v17 = vadd.f32 %v1213_v15, %v1212_v13  ;;  %v1225_v18 = vrot.slane %v1224_v16, 2 }
 0x18b   : >> { %v1215_v19 = vrot.slane %v1214_v17, 1  ;;  %v1226_v20 = vadd.f32 %v1225_v18, %v1224_v16 }
 0x18d   : >> { %v1216_v22 = vadd.f32 %v1215_v19, %v1214_v17  ;;  %v1227_v23 = vrot.slane %v1226_v20, 1 }
 0x18f   : >> { %v1217_v25 = vadd.f32 %v1216_v22, %v1209_v21  ;;  %v1228_v26 = vadd.f32 %v1227_v23, %v1226_v20  ;;  %325 = sbr.rel (!%p323_p6) target bundleno = 18 (0x12), region = 115 }
 0x191   : >> { %1218 = vst [vmem:[%s2682_s4] sm:$0x1] %v1217_v25  ;;  %v1229_v27 = vadd.f32 %v1228_v26, %v1219_v24 }
 0x193   : >> { %1230 = vst [vmem:[%s2683_s5] sm:$0x1] %v1229_v27 }
 0x194 PF: > { %s16_s20 = sadd.s32 1, %s2119_s20   ;;  %s2684_s18 = smov %s2115_s19 }
 0x195   : > { %p13_p7 = scmp.ge.s32.totalorder %s16_s20, 4   ;;  %s2685_s19 = smov %s2687_s21 }
 0x197   :  { %15 = sbr.rel (!%p13_p7) target bundleno = 2 (0x2), region = 126 }

</bundles_post_ra>
